<compile_context>
chip_gen: v6e
topology: v6e:2x2x1
jax: 0.10.0
libtpu: 0.0.40
codegen_flags: <defaults>
</compile_context>

<pallas_src>
import functools

import jax
import jax.numpy as jnp
from jax import lax
from jax.experimental import pallas as pl
from jax.experimental.pallas import tpu as pltpu


def _roll_amounts(W, HWp):
    """Static lane-roll amounts for the separable 5x5 'same' max pool on the
    folded (padded) spatial axis: +-1,+-2 columns (W-pass) and +-1,+-2 rows
    (H-pass).  Deduped per pass; zero amounts dropped."""
    w_amts, h_amts = [], []
    for s in (1, 2):
        for a in (s % HWp, (-s) % HWp):
            if a != 0 and a not in w_amts:
                w_amts.append(a)
        for a in ((s * W) % HWp, (-(s * W)) % HWp):
            if a != 0 and a not in h_amts:
                h_amts.append(a)
    return tuple(w_amts), tuple(h_amts)


def _crp_kernel(pos_ref, x_ref, w_ref, o_ref, *, n_stages, w_amts, h_amts):
    S, HWp = x_ref.shape

    # ---- build pool masks once per grid step, pre-broadcast to (S, HWp) ----
    # pos_ref: (2, HWp) int32 = [h; w] per lane, padded lanes get sentinel -100
    # so they can never pass the equality checks against a valid position.
    pos = pos_ref[...]
    hpos = pos[0:1, :]
    wpos = pos[1:2, :]

    def masks_for(amts, along_w):
        out = []
        for a in amts:
            rp = pltpu.roll(pos, shift=a, axis=1)       # roll h and w together
            rh, rw = rp[0:1, :], rp[1:2, :]
            if along_w:   # W-pass: same row, |dw| <= 2 (source in-image by equality)
                m = (rh == hpos) & (jnp.abs(rw - wpos) <= 2)
            else:         # H-pass: same column, |dh| <= 2
                m = (rw == wpos) & (jnp.abs(rh - hpos) <= 2)
            out.append((a, jnp.broadcast_to(m, (S, HWp))))   # hoisted broadcast
        return out

    w_masks = masks_for(w_amts, True)
    h_masks = masks_for(h_amts, False)

    def maxpool5x5(t):
        # Separable running max; invalid neighbors fall back to the center
        # value (equivalent to -inf "same" padding since the center is in the
        # window).  Position-based masks make this roll-direction agnostic.
        r = t
        for a, m in w_masks:
            r = jnp.maximum(r, jnp.where(m, pltpu.roll(t, shift=a, axis=1), t))
        out = r
        for a, m in h_masks:
            out = jnp.maximum(out, jnp.where(m, pltpu.roll(r, shift=a, axis=1), r))
        return out

    x = x_ref[...]                                   # compute dtype == input dtype
    top = x
    for i in range(n_stages):
        pooled = maxpool5x5(top)
        # Block-diagonal 1x1 conv on the MXU, f32 accumulation.
        top = jnp.dot(w_ref[i], pooled,
                      preferred_element_type=jnp.float32).astype(x.dtype)
        x = x + top
    o_ref[...] = x


def _choose_block_rows(S_total, C, HWp, itemsize, n_stages):
    """Rows per block: whole batch elements (multiple of C), dividing the row
    axis, preferably filling sublanes, within a modest VMEM budget."""
    sublane = max(8, 32 // itemsize)          # 8 rows f32, 16 rows bf16
    act_budget = 4 << 20                      # per activation buffer
    max_rows_weight = 1024                    # cap block-diag weight blow-up

    cands = [k * C for k in range(1, S_total // C + 1) if S_total % (k * C) == 0]

    def fits(s):
        return (s * HWp * itemsize <= act_budget
                and (s <= max_rows_weight or s == C))

    best = None
    for s in cands:                           # largest full-sublane block that fits
        if fits(s) and s % sublane == 0:
            best = s
    if best is None:
        for s in cands:                       # else largest fitting block
            if fits(s):
                best = s
    if best is None:
        best = C
    # Pallas (8,128) rule: row block must be a multiple of 8 or the full axis.
    if best % 8 != 0 and best != S_total:
        best = S_total
    return best


def crp_block(x_nchw, weights):
    """x_nchw: (B, C, H, W); weights: list of (C, C) 1x1-conv weights (bias-free)."""
    n_stages = len(weights)
    B, C, H, W = x_nchw.shape
    for w in weights:
        assert w.shape == (C, C), "CRPBlock residual add requires in_planes == out_planes"
    dtype = x_nchw.dtype
    itemsize = jnp.dtype(dtype).itemsize
    HW = H * W
    HWp = ((HW + 127) // 128) * 128           # lane-dense (unmasked stores)
    S_total = B * C

    # Free reshape to (B*C, HW); pad the lane axis with zeros if needed.
    x2 = x_nchw.reshape(S_total, HW)
    if HWp != HW:
        x2 = jnp.pad(x2, ((0, 0), (0, HWp - HW)))

    # Per-lane (h, w) positions; padded lanes get a sentinel.
    lane = jnp.arange(HWp, dtype=jnp.int32)
    valid = lane < HW
    hpos = jnp.where(valid, lane // W, -100)
    wpos = jnp.where(valid, lane % W, -100)
    pos = jnp.stack([hpos, wpos])             # (2, HWp) int32

    S_blk = _choose_block_rows(S_total, C, HWp, itemsize, n_stages)
    B_blk = S_blk // C

    # Stage weights in compute dtype; block-diagonal over packed batch elements.
    wstack = jnp.stack([w.astype(dtype) for w in weights])            # (n, C, C)
    if B_blk == 1:
        wbig = wstack
    else:
        eye = jnp.eye(B_blk, dtype=dtype)
        wbig = jnp.einsum("ab,nij->naibj", eye, wstack).reshape(
            n_stages, S_blk, S_blk)

    w_amts, h_amts = _roll_amounts(W, HWp)
    kernel = functools.partial(_crp_kernel, n_stages=n_stages,
                               w_amts=w_amts, h_amts=h_amts)

    grid = (S_total // S_blk,)
    block_bytes = S_blk * HWp * itemsize
    vmem_limit = int(min(100 << 20,
                         max(32 << 20,
                             10 * block_bytes
                             + n_stages * S_blk * S_blk * itemsize
                             + 2 * HWp * 4)))

    cost = pl.CostEstimate(
        flops=int(n_stages * B * HW * (2 * C * C + 16 * C)),
        transcendentals=0,
        bytes_accessed=int(2 * S_total * HWp * itemsize
                           + n_stages * S_blk * S_blk * itemsize + 2 * HWp * 4),
    )

    out2 = pl.pallas_call(
        kernel,
        out_shape=jax.ShapeDtypeStruct((S_total, HWp), dtype),
        grid_spec=pltpu.PrefetchScalarGridSpec(
            num_scalar_prefetch=0,
            grid=grid,
            in_specs=[
                pl.BlockSpec((2, HWp), lambda r: (0, 0)),                     # positions (resident)
                pl.BlockSpec((S_blk, HWp), lambda r: (r, 0)),                 # activation row block
                pl.BlockSpec((n_stages, S_blk, S_blk), lambda r: (0, 0, 0)),  # weights (resident)
            ],
            out_specs=pl.BlockSpec((S_blk, HWp), lambda r: (r, 0)),
        ),
        compiler_params=pltpu.CompilerParams(
            dimension_semantics=("parallel",),
            vmem_limit_bytes=vmem_limit,
        ),
        cost_estimate=cost,
    )(pos, x2, wbig)

    return out2[:, :HW].reshape(B, C, H, W)


def crp_reference(x_nchw, weights):
    """Pure-JAX reference (NCHW, matches PyTorch semantics)."""
    x = x_nchw
    top = x
    for w in weights:
        top = lax.reduce_window(
            top, -jnp.inf, lax.max,
            window_dimensions=(1, 1, 5, 5),
            window_strides=(1, 1, 1, 1),
            padding=[(0, 0), (0, 0), (2, 2), (2, 2)],
        )
        top = jnp.einsum("oi,bihw->bohw", w, top, precision="highest")
        x = top + x
    return x


if __name__ == "__main__":
    B, C, H, W = 2, 4, 16, 16
    n_stages = 4  # in_planes == out_planes == C (required by the residual add)

    key = jax.random.PRNGKey(0)
    kx, kw = jax.random.split(key)
    x = jax.random.normal(kx, (B, C, H, W), dtype=jnp.float32)
    wkeys = jax.random.split(kw, n_stages)
    weights = [
        jax.random.normal(wkeys[i], (C, C), dtype=jnp.float32) / jnp.sqrt(C)
        for i in range(n_stages)
    ]

    out = crp_block(x, weights)
    out = jax.block_until_ready(out)
    ref = crp_reference(x, weights)

    assert out.shape == (B, C, H, W)
    assert jnp.allclose(out, ref, atol=1e-3, rtol=1e-3), "mismatch vs reference"
    print("KERNEL_OK")
</pallas_src>

<mosaic_0001>
module attributes {stable_mosaic.version = 11 : i64} {
  func.func @_crp_kernel(%arg0: i32, %arg1: memref<2x256xi32, #tpu.memory_space<vmem>>, %arg2: memref<8x256xf32, #tpu.memory_space<vmem>>, %arg3: memref<4x8x8xf32, #tpu.memory_space<vmem>>, %arg4: memref<8x256xf32, #tpu.memory_space<vmem>>) attributes {dimension_semantics = [#tpu.dimension_semantics<parallel>], iteration_bounds = array<i64: 1>, scalar_prefetch = 0 : i64, scratch_operands = 0 : i64, tpu.core_type = #tpu.core_type<tc>, window_params = [{pipeline_mode = #tpu.pipeline_mode<synchronous>, transform_indices = @transform_0, window_bounds = array<i64: 2, 256>}, {transform_indices = @transform_1, window_bounds = array<i64: 8, 256>}, {pipeline_mode = #tpu.pipeline_mode<synchronous>, transform_indices = @transform_2, window_bounds = array<i64: 4, 8, 8>}, {transform_indices = @transform_3, window_bounds = array<i64: 8, 256>}]} {
    %c0 = arith.constant 0 : index
    %c0_0 = arith.constant 0 : index
    %0 = vector.load %arg1[%c0, %c0_0] : memref<2x256xi32, #tpu.memory_space<vmem>>, vector<2x256xi32>
    %1 = vector.extract_strided_slice %0 {offsets = [0, 0], sizes = [1, 256], strides = [1, 1]} : vector<2x256xi32> to vector<1x256xi32>
    %2 = vector.extract_strided_slice %0 {offsets = [1, 0], sizes = [1, 256], strides = [1, 1]} : vector<2x256xi32> to vector<1x256xi32>
    %c1_i32 = arith.constant 1 : i32
    %3 = tpu.dynamic_rotate %0 by %c1_i32 dim 1 : vector<2x256xi32>, i32 -> vector<2x256xi32>
    %4 = vector.extract_strided_slice %3 {offsets = [0, 0], sizes = [1, 256], strides = [1, 1]} : vector<2x256xi32> to vector<1x256xi32>
    %5 = vector.extract_strided_slice %3 {offsets = [1, 0], sizes = [1, 256], strides = [1, 1]} : vector<2x256xi32> to vector<1x256xi32>
    %6 = arith.cmpi eq, %4, %1 : vector<1x256xi32>
    %7 = arith.subi %5, %2 : vector<1x256xi32>
    %8 = math.absi %7 : vector<1x256xi32>
    %c2_i32 = arith.constant 2 : i32
    %9 = vector.broadcast %c2_i32 : i32 to vector<1x256xi32>
    %10 = arith.cmpi sle, %8, %9 : vector<1x256xi32>
    %11 = arith.andi %6, %10 : vector<1x256xi1>
    %12 = vector.shape_cast %11 : vector<1x256xi1> to vector<1x256xi1>
    %13 = vector.broadcast %12 : vector<1x256xi1> to vector<8x256xi1>
    %c255_i32 = arith.constant 255 : i32
    %14 = tpu.dynamic_rotate %0 by %c255_i32 dim 1 : vector<2x256xi32>, i32 -> vector<2x256xi32>
    %15 = vector.extract_strided_slice %14 {offsets = [0, 0], sizes = [1, 256], strides = [1, 1]} : vector<2x256xi32> to vector<1x256xi32>
    %16 = vector.extract_strided_slice %14 {offsets = [1, 0], sizes = [1, 256], strides = [1, 1]} : vector<2x256xi32> to vector<1x256xi32>
    %17 = arith.cmpi eq, %15, %1 : vector<1x256xi32>
    %18 = arith.subi %16, %2 : vector<1x256xi32>
    %19 = math.absi %18 : vector<1x256xi32>
    %c2_i32_1 = arith.constant 2 : i32
    %20 = vector.broadcast %c2_i32_1 : i32 to vector<1x256xi32>
    %21 = arith.cmpi sle, %19, %20 : vector<1x256xi32>
    %22 = arith.andi %17, %21 : vector<1x256xi1>
    %23 = vector.shape_cast %22 : vector<1x256xi1> to vector<1x256xi1>
    %24 = vector.broadcast %23 : vector<1x256xi1> to vector<8x256xi1>
    %c2_i32_2 = arith.constant 2 : i32
    %25 = tpu.dynamic_rotate %0 by %c2_i32_2 dim 1 : vector<2x256xi32>, i32 -> vector<2x256xi32>
    %26 = vector.extract_strided_slice %25 {offsets = [0, 0], sizes = [1, 256], strides = [1, 1]} : vector<2x256xi32> to vector<1x256xi32>
    %27 = vector.extract_strided_slice %25 {offsets = [1, 0], sizes = [1, 256], strides = [1, 1]} : vector<2x256xi32> to vector<1x256xi32>
    %28 = arith.cmpi eq, %26, %1 : vector<1x256xi32>
    %29 = arith.subi %27, %2 : vector<1x256xi32>
    %30 = math.absi %29 : vector<1x256xi32>
    %c2_i32_3 = arith.constant 2 : i32
    %31 = vector.broadcast %c2_i32_3 : i32 to vector<1x256xi32>
    %32 = arith.cmpi sle, %30, %31 : vector<1x256xi32>
    %33 = arith.andi %28, %32 : vector<1x256xi1>
    %34 = vector.shape_cast %33 : vector<1x256xi1> to vector<1x256xi1>
    %35 = vector.broadcast %34 : vector<1x256xi1> to vector<8x256xi1>
    %c254_i32 = arith.constant 254 : i32
    %36 = tpu.dynamic_rotate %0 by %c254_i32 dim 1 : vector<2x256xi32>, i32 -> vector<2x256xi32>
    %37 = vector.extract_strided_slice %36 {offsets = [0, 0], sizes = [1, 256], strides = [1, 1]} : vector<2x256xi32> to vector<1x256xi32>
    %38 = vector.extract_strided_slice %36 {offsets = [1, 0], sizes = [1, 256], strides = [1, 1]} : vector<2x256xi32> to vector<1x256xi32>
    %39 = arith.cmpi eq, %37, %1 : vector<1x256xi32>
    %40 = arith.subi %38, %2 : vector<1x256xi32>
    %41 = math.absi %40 : vector<1x256xi32>
    %c2_i32_4 = arith.constant 2 : i32
    %42 = vector.broadcast %c2_i32_4 : i32 to vector<1x256xi32>
    %43 = arith.cmpi sle, %41, %42 : vector<1x256xi32>
    %44 = arith.andi %39, %43 : vector<1x256xi1>
    %45 = vector.shape_cast %44 : vector<1x256xi1> to vector<1x256xi1>
    %46 = vector.broadcast %45 : vector<1x256xi1> to vector<8x256xi1>
    %c16_i32 = arith.constant 16 : i32
    %47 = tpu.dynamic_rotate %0 by %c16_i32 dim 1 : vector<2x256xi32>, i32 -> vector<2x256xi32>
    %48 = vector.extract_strided_slice %47 {offsets = [0, 0], sizes = [1, 256], strides = [1, 1]} : vector<2x256xi32> to vector<1x256xi32>
    %49 = vector.extract_strided_slice %47 {offsets = [1, 0], sizes = [1, 256], strides = [1, 1]} : vector<2x256xi32> to vector<1x256xi32>
    %50 = arith.cmpi eq, %49, %2 : vector<1x256xi32>
    %51 = arith.subi %48, %1 : vector<1x256xi32>
    %52 = math.absi %51 : vector<1x256xi32>
    %c2_i32_5 = arith.constant 2 : i32
    %53 = vector.broadcast %c2_i32_5 : i32 to vector<1x256xi32>
    %54 = arith.cmpi sle, %52, %53 : vector<1x256xi32>
    %55 = arith.andi %50, %54 : vector<1x256xi1>
    %56 = vector.shape_cast %55 : vector<1x256xi1> to vector<1x256xi1>
    %57 = vector.broadcast %56 : vector<1x256xi1> to vector<8x256xi1>
    %c240_i32 = arith.constant 240 : i32
    %58 = tpu.dynamic_rotate %0 by %c240_i32 dim 1 : vector<2x256xi32>, i32 -> vector<2x256xi32>
    %59 = vector.extract_strided_slice %58 {offsets = [0, 0], sizes = [1, 256], strides = [1, 1]} : vector<2x256xi32> to vector<1x256xi32>
    %60 = vector.extract_strided_slice %58 {offsets = [1, 0], sizes = [1, 256], strides = [1, 1]} : vector<2x256xi32> to vector<1x256xi32>
    %61 = arith.cmpi eq, %60, %2 : vector<1x256xi32>
    %62 = arith.subi %59, %1 : vector<1x256xi32>
    %63 = math.absi %62 : vector<1x256xi32>
    %c2_i32_6 = arith.constant 2 : i32
    %64 = vector.broadcast %c2_i32_6 : i32 to vector<1x256xi32>
    %65 = arith.cmpi sle, %63, %64 : vector<1x256xi32>
    %66 = arith.andi %61, %65 : vector<1x256xi1>
    %67 = vector.shape_cast %66 : vector<1x256xi1> to vector<1x256xi1>
    %68 = vector.broadcast %67 : vector<1x256xi1> to vector<8x256xi1>
    %c32_i32 = arith.constant 32 : i32
    %69 = tpu.dynamic_rotate %0 by %c32_i32 dim 1 : vector<2x256xi32>, i32 -> vector<2x256xi32>
    %70 = vector.extract_strided_slice %69 {offsets = [0, 0], sizes = [1, 256], strides = [1, 1]} : vector<2x256xi32> to vector<1x256xi32>
    %71 = vector.extract_strided_slice %69 {offsets = [1, 0], sizes = [1, 256], strides = [1, 1]} : vector<2x256xi32> to vector<1x256xi32>
    %72 = arith.cmpi eq, %71, %2 : vector<1x256xi32>
    %73 = arith.subi %70, %1 : vector<1x256xi32>
    %74 = math.absi %73 : vector<1x256xi32>
    %c2_i32_7 = arith.constant 2 : i32
    %75 = vector.broadcast %c2_i32_7 : i32 to vector<1x256xi32>
    %76 = arith.cmpi sle, %74, %75 : vector<1x256xi32>
    %77 = arith.andi %72, %76 : vector<1x256xi1>
    %78 = vector.shape_cast %77 : vector<1x256xi1> to vector<1x256xi1>
    %79 = vector.broadcast %78 : vector<1x256xi1> to vector<8x256xi1>
    %c224_i32 = arith.constant 224 : i32
    %80 = tpu.dynamic_rotate %0 by %c224_i32 dim 1 : vector<2x256xi32>, i32 -> vector<2x256xi32>
    %81 = vector.extract_strided_slice %80 {offsets = [0, 0], sizes = [1, 256], strides = [1, 1]} : vector<2x256xi32> to vector<1x256xi32>
    %82 = vector.extract_strided_slice %80 {offsets = [1, 0], sizes = [1, 256], strides = [1, 1]} : vector<2x256xi32> to vector<1x256xi32>
    %83 = arith.cmpi eq, %82, %2 : vector<1x256xi32>
    %84 = arith.subi %81, %1 : vector<1x256xi32>
    %85 = math.absi %84 : vector<1x256xi32>
    %c2_i32_8 = arith.constant 2 : i32
    %86 = vector.broadcast %c2_i32_8 : i32 to vector<1x256xi32>
    %87 = arith.cmpi sle, %85, %86 : vector<1x256xi32>
    %88 = arith.andi %83, %87 : vector<1x256xi1>
    %89 = vector.shape_cast %88 : vector<1x256xi1> to vector<1x256xi1>
    %90 = vector.broadcast %89 : vector<1x256xi1> to vector<8x256xi1>
    %c0_9 = arith.constant 0 : index
    %c0_10 = arith.constant 0 : index
    %91 = vector.load %arg2[%c0_9, %c0_10] : memref<8x256xf32, #tpu.memory_space<vmem>>, vector<8x256xf32>
    %c1_i32_11 = arith.constant 1 : i32
    %92 = tpu.dynamic_rotate %91 by %c1_i32_11 dim 1 : vector<8x256xf32>, i32 -> vector<8x256xf32>
    %93 = arith.select %13, %92, %91 : vector<8x256xi1>, vector<8x256xf32>
    %94 = arith.maximumf %91, %93 : vector<8x256xf32>
    %c255_i32_12 = arith.constant 255 : i32
    %95 = tpu.dynamic_rotate %91 by %c255_i32_12 dim 1 : vector<8x256xf32>, i32 -> vector<8x256xf32>
    %96 = arith.select %24, %95, %91 : vector<8x256xi1>, vector<8x256xf32>
    %97 = arith.maximumf %94, %96 : vector<8x256xf32>
    %c2_i32_13 = arith.constant 2 : i32
    %98 = tpu.dynamic_rotate %91 by %c2_i32_13 dim 1 : vector<8x256xf32>, i32 -> vector<8x256xf32>
    %99 = arith.select %35, %98, %91 : vector<8x256xi1>, vector<8x256xf32>
    %100 = arith.maximumf %97, %99 : vector<8x256xf32>
    %c254_i32_14 = arith.constant 254 : i32
    %101 = tpu.dynamic_rotate %91 by %c254_i32_14 dim 1 : vector<8x256xf32>, i32 -> vector<8x256xf32>
    %102 = arith.select %46, %101, %91 : vector<8x256xi1>, vector<8x256xf32>
    %103 = arith.maximumf %100, %102 : vector<8x256xf32>
    %c16_i32_15 = arith.constant 16 : i32
    %104 = tpu.dynamic_rotate %103 by %c16_i32_15 dim 1 : vector<8x256xf32>, i32 -> vector<8x256xf32>
    %105 = arith.select %57, %104, %103 : vector<8x256xi1>, vector<8x256xf32>
    %106 = arith.maximumf %103, %105 : vector<8x256xf32>
    %c240_i32_16 = arith.constant 240 : i32
    %107 = tpu.dynamic_rotate %103 by %c240_i32_16 dim 1 : vector<8x256xf32>, i32 -> vector<8x256xf32>
    %108 = arith.select %68, %107, %103 : vector<8x256xi1>, vector<8x256xf32>
    %109 = arith.maximumf %106, %108 : vector<8x256xf32>
    %c32_i32_17 = arith.constant 32 : i32
    %110 = tpu.dynamic_rotate %103 by %c32_i32_17 dim 1 : vector<8x256xf32>, i32 -> vector<8x256xf32>
    %111 = arith.select %79, %110, %103 : vector<8x256xi1>, vector<8x256xf32>
    %112 = arith.maximumf %109, %111 : vector<8x256xf32>
    %c224_i32_18 = arith.constant 224 : i32
    %113 = tpu.dynamic_rotate %103 by %c224_i32_18 dim 1 : vector<8x256xf32>, i32 -> vector<8x256xf32>
    %114 = arith.select %90, %113, %103 : vector<8x256xi1>, vector<8x256xf32>
    %115 = arith.maximumf %112, %114 : vector<8x256xf32>
    %c0_19 = arith.constant 0 : index
    %c0_20 = arith.constant 0 : index
    %c0_21 = arith.constant 0 : index
    %116 = vector.load %arg3[%c0_19, %c0_20, %c0_21] : memref<4x8x8xf32, #tpu.memory_space<vmem>>, vector<1x8x8xf32>
    %117 = vector.shape_cast %116 : vector<1x8x8xf32> to vector<8x8xf32>
    %cst = arith.constant dense<0.000000e+00> : vector<8x256xf32>
    %118 = tpu.matmul %117, %115, %cst {dimension_numbers = #tpu.dot_dimension_numbers<[1], [0], [0], [1], [0, 0, 1, 1], [], []>} : vector<8x8xf32>, vector<8x256xf32>, vector<8x256xf32> -> vector<8x256xf32>
    %119 = arith.addf %91, %118 : vector<8x256xf32>
    %c1_i32_22 = arith.constant 1 : i32
    %120 = tpu.dynamic_rotate %118 by %c1_i32_22 dim 1 : vector<8x256xf32>, i32 -> vector<8x256xf32>
    %121 = arith.select %13, %120, %118 : vector<8x256xi1>, vector<8x256xf32>
    %122 = arith.maximumf %118, %121 : vector<8x256xf32>
    %c255_i32_23 = arith.constant 255 : i32
    %123 = tpu.dynamic_rotate %118 by %c255_i32_23 dim 1 : vector<8x256xf32>, i32 -> vector<8x256xf32>
    %124 = arith.select %24, %123, %118 : vector<8x256xi1>, vector<8x256xf32>
    %125 = arith.maximumf %122, %124 : vector<8x256xf32>
    %c2_i32_24 = arith.constant 2 : i32
    %126 = tpu.dynamic_rotate %118 by %c2_i32_24 dim 1 : vector<8x256xf32>, i32 -> vector<8x256xf32>
    %127 = arith.select %35, %126, %118 : vector<8x256xi1>, vector<8x256xf32>
    %128 = arith.maximumf %125, %127 : vector<8x256xf32>
    %c254_i32_25 = arith.constant 254 : i32
    %129 = tpu.dynamic_rotate %118 by %c254_i32_25 dim 1 : vector<8x256xf32>, i32 -> vector<8x256xf32>
    %130 = arith.select %46, %129, %118 : vector<8x256xi1>, vector<8x256xf32>
    %131 = arith.maximumf %128, %130 : vector<8x256xf32>
    %c16_i32_26 = arith.constant 16 : i32
    %132 = tpu.dynamic_rotate %131 by %c16_i32_26 dim 1 : vector<8x256xf32>, i32 -> vector<8x256xf32>
    %133 = arith.select %57, %132, %131 : vector<8x256xi1>, vector<8x256xf32>
    %134 = arith.maximumf %131, %133 : vector<8x256xf32>
    %c240_i32_27 = arith.constant 240 : i32
    %135 = tpu.dynamic_rotate %131 by %c240_i32_27 dim 1 : vector<8x256xf32>, i32 -> vector<8x256xf32>
    %136 = arith.select %68, %135, %131 : vector<8x256xi1>, vector<8x256xf32>
    %137 = arith.maximumf %134, %136 : vector<8x256xf32>
    %c32_i32_28 = arith.constant 32 : i32
    %138 = tpu.dynamic_rotate %131 by %c32_i32_28 dim 1 : vector<8x256xf32>, i32 -> vector<8x256xf32>
    %139 = arith.select %79, %138, %131 : vector<8x256xi1>, vector<8x256xf32>
    %140 = arith.maximumf %137, %139 : vector<8x256xf32>
    %c224_i32_29 = arith.constant 224 : i32
    %141 = tpu.dynamic_rotate %131 by %c224_i32_29 dim 1 : vector<8x256xf32>, i32 -> vector<8x256xf32>
    %142 = arith.select %90, %141, %131 : vector<8x256xi1>, vector<8x256xf32>
    %143 = arith.maximumf %140, %142 : vector<8x256xf32>
    %c1 = arith.constant 1 : index
    %c0_30 = arith.constant 0 : index
    %c0_31 = arith.constant 0 : index
    %144 = vector.load %arg3[%c1, %c0_30, %c0_31] : memref<4x8x8xf32, #tpu.memory_space<vmem>>, vector<1x8x8xf32>
    %145 = vector.shape_cast %144 : vector<1x8x8xf32> to vector<8x8xf32>
    %cst_32 = arith.constant dense<0.000000e+00> : vector<8x256xf32>
    %146 = tpu.matmul %145, %143, %cst_32 {dimension_numbers = #tpu.dot_dimension_numbers<[1], [0], [0], [1], [0, 0, 1, 1], [], []>} : vector<8x8xf32>, vector<8x256xf32>, vector<8x256xf32> -> vector<8x256xf32>
    %147 = arith.addf %119, %146 : vector<8x256xf32>
    %c1_i32_33 = arith.constant 1 : i32
    %148 = tpu.dynamic_rotate %146 by %c1_i32_33 dim 1 : vector<8x256xf32>, i32 -> vector<8x256xf32>
    %149 = arith.select %13, %148, %146 : vector<8x256xi1>, vector<8x256xf32>
    %150 = arith.maximumf %146, %149 : vector<8x256xf32>
    %c255_i32_34 = arith.constant 255 : i32
    %151 = tpu.dynamic_rotate %146 by %c255_i32_34 dim 1 : vector<8x256xf32>, i32 -> vector<8x256xf32>
    %152 = arith.select %24, %151, %146 : vector<8x256xi1>, vector<8x256xf32>
    %153 = arith.maximumf %150, %152 : vector<8x256xf32>
    %c2_i32_35 = arith.constant 2 : i32
    %154 = tpu.dynamic_rotate %146 by %c2_i32_35 dim 1 : vector<8x256xf32>, i32 -> vector<8x256xf32>
    %155 = arith.select %35, %154, %146 : vector<8x256xi1>, vector<8x256xf32>
    %156 = arith.maximumf %153, %155 : vector<8x256xf32>
    %c254_i32_36 = arith.constant 254 : i32
    %157 = tpu.dynamic_rotate %146 by %c254_i32_36 dim 1 : vector<8x256xf32>, i32 -> vector<8x256xf32>
    %158 = arith.select %46, %157, %146 : vector<8x256xi1>, vector<8x256xf32>
    %159 = arith.maximumf %156, %158 : vector<8x256xf32>
    %c16_i32_37 = arith.constant 16 : i32
    %160 = tpu.dynamic_rotate %159 by %c16_i32_37 dim 1 : vector<8x256xf32>, i32 -> vector<8x256xf32>
    %161 = arith.select %57, %160, %159 : vector<8x256xi1>, vector<8x256xf32>
    %162 = arith.maximumf %159, %161 : vector<8x256xf32>
    %c240_i32_38 = arith.constant 240 : i32
    %163 = tpu.dynamic_rotate %159 by %c240_i32_38 dim 1 : vector<8x256xf32>, i32 -> vector<8x256xf32>
    %164 = arith.select %68, %163, %159 : vector<8x256xi1>, vector<8x256xf32>
    %165 = arith.maximumf %162, %164 : vector<8x256xf32>
    %c32_i32_39 = arith.constant 32 : i32
    %166 = tpu.dynamic_rotate %159 by %c32_i32_39 dim 1 : vector<8x256xf32>, i32 -> vector<8x256xf32>
    %167 = arith.select %79, %166, %159 : vector<8x256xi1>, vector<8x256xf32>
    %168 = arith.maximumf %165, %167 : vector<8x256xf32>
    %c224_i32_40 = arith.constant 224 : i32
    %169 = tpu.dynamic_rotate %159 by %c224_i32_40 dim 1 : vector<8x256xf32>, i32 -> vector<8x256xf32>
    %170 = arith.select %90, %169, %159 : vector<8x256xi1>, vector<8x256xf32>
    %171 = arith.maximumf %168, %170 : vector<8x256xf32>
    %c2 = arith.constant 2 : index
    %c0_41 = arith.constant 0 : index
    %c0_42 = arith.constant 0 : index
    %172 = vector.load %arg3[%c2, %c0_41, %c0_42] : memref<4x8x8xf32, #tpu.memory_space<vmem>>, vector<1x8x8xf32>
    %173 = vector.shape_cast %172 : vector<1x8x8xf32> to vector<8x8xf32>
    %cst_43 = arith.constant dense<0.000000e+00> : vector<8x256xf32>
    %174 = tpu.matmul %173, %171, %cst_43 {dimension_numbers = #tpu.dot_dimension_numbers<[1], [0], [0], [1], [0, 0, 1, 1], [], []>} : vector<8x8xf32>, vector<8x256xf32>, vector<8x256xf32> -> vector<8x256xf32>
    %175 = arith.addf %147, %174 : vector<8x256xf32>
    %c1_i32_44 = arith.constant 1 : i32
    %176 = tpu.dynamic_rotate %174 by %c1_i32_44 dim 1 : vector<8x256xf32>, i32 -> vector<8x256xf32>
    %177 = arith.select %13, %176, %174 : vector<8x256xi1>, vector<8x256xf32>
    %178 = arith.maximumf %174, %177 : vector<8x256xf32>
    %c255_i32_45 = arith.constant 255 : i32
    %179 = tpu.dynamic_rotate %174 by %c255_i32_45 dim 1 : vector<8x256xf32>, i32 -> vector<8x256xf32>
    %180 = arith.select %24, %179, %174 : vector<8x256xi1>, vector<8x256xf32>
    %181 = arith.maximumf %178, %180 : vector<8x256xf32>
    %c2_i32_46 = arith.constant 2 : i32
    %182 = tpu.dynamic_rotate %174 by %c2_i32_46 dim 1 : vector<8x256xf32>, i32 -> vector<8x256xf32>
    %183 = arith.select %35, %182, %174 : vector<8x256xi1>, vector<8x256xf32>
    %184 = arith.maximumf %181, %183 : vector<8x256xf32>
    %c254_i32_47 = arith.constant 254 : i32
    %185 = tpu.dynamic_rotate %174 by %c254_i32_47 dim 1 : vector<8x256xf32>, i32 -> vector<8x256xf32>
    %186 = arith.select %46, %185, %174 : vector<8x256xi1>, vector<8x256xf32>
    %187 = arith.maximumf %184, %186 : vector<8x256xf32>
    %c16_i32_48 = arith.constant 16 : i32
    %188 = tpu.dynamic_rotate %187 by %c16_i32_48 dim 1 : vector<8x256xf32>, i32 -> vector<8x256xf32>
    %189 = arith.select %57, %188, %187 : vector<8x256xi1>, vector<8x256xf32>
    %190 = arith.maximumf %187, %189 : vector<8x256xf32>
    %c240_i32_49 = arith.constant 240 : i32
    %191 = tpu.dynamic_rotate %187 by %c240_i32_49 dim 1 : vector<8x256xf32>, i32 -> vector<8x256xf32>
    %192 = arith.select %68, %191, %187 : vector<8x256xi1>, vector<8x256xf32>
    %193 = arith.maximumf %190, %192 : vector<8x256xf32>
    %c32_i32_50 = arith.constant 32 : i32
    %194 = tpu.dynamic_rotate %187 by %c32_i32_50 dim 1 : vector<8x256xf32>, i32 -> vector<8x256xf32>
    %195 = arith.select %79, %194, %187 : vector<8x256xi1>, vector<8x256xf32>
    %196 = arith.maximumf %193, %195 : vector<8x256xf32>
    %c224_i32_51 = arith.constant 224 : i32
    %197 = tpu.dynamic_rotate %187 by %c224_i32_51 dim 1 : vector<8x256xf32>, i32 -> vector<8x256xf32>
    %198 = arith.select %90, %197, %187 : vector<8x256xi1>, vector<8x256xf32>
    %199 = arith.maximumf %196, %198 : vector<8x256xf32>
    %c3 = arith.constant 3 : index
    %c0_52 = arith.constant 0 : index
    %c0_53 = arith.constant 0 : index
    %200 = vector.load %arg3[%c3, %c0_52, %c0_53] : memref<4x8x8xf32, #tpu.memory_space<vmem>>, vector<1x8x8xf32>
    %201 = vector.shape_cast %200 : vector<1x8x8xf32> to vector<8x8xf32>
    %cst_54 = arith.constant dense<0.000000e+00> : vector<8x256xf32>
    %202 = tpu.matmul %201, %199, %cst_54 {dimension_numbers = #tpu.dot_dimension_numbers<[1], [0], [0], [1], [0, 0, 1, 1], [], []>} : vector<8x8xf32>, vector<8x256xf32>, vector<8x256xf32> -> vector<8x256xf32>
    %203 = arith.addf %175, %202 : vector<8x256xf32>
    %c0_55 = arith.constant 0 : index
    %c0_56 = arith.constant 0 : index
    %204 = vector.load %arg4[%c0_55, %c0_56] : memref<8x256xf32, #tpu.memory_space<vmem>>, vector<8x256xf32>
    tpu.vector_store %arg4[%c0_55, %c0_56], %203 {strides = array<i32>} : memref<8x256xf32, #tpu.memory_space<vmem>>, vector<8x256xf32>,
    return
  }
  func.func @transform_0(%arg0: i32) -> (i32, i32) {
    %c0_i32 = arith.constant 0 : i32
    %c0_i32_0 = arith.constant 0 : i32
    %c0_i32_1 = arith.constant 0 : i32
    return %c0_i32, %c0_i32_0 : i32, i32
  }
  func.func @transform_1(%arg0: i32) -> (i32, i32) {
    %c0_i32 = arith.constant 0 : i32
    %c0_i32_0 = arith.constant 0 : i32
    return %arg0, %c0_i32 : i32, i32
  }
  func.func @transform_2(%arg0: i32) -> (i32, i32, i32) {
    %c0_i32 = arith.constant 0 : i32
    %c0_i32_0 = arith.constant 0 : i32
    %c0_i32_1 = arith.constant 0 : i32
    %c0_i32_2 = arith.constant 0 : i32
    return %c0_i32, %c0_i32_0, %c0_i32_1 : i32, i32, i32
  }
  func.func @transform_3(%arg0: i32) -> (i32, i32) {
    %c0_i32 = arith.constant 0 : i32
    %c0_i32_0 = arith.constant 0 : i32
    return %arg0, %c0_i32 : i32, i32
  }
}

</mosaic_0001>

<bundles_post_ra>
// kernel: tpu_custom_call.1
= control target key start
LH: loop header
LB: loop body
LE: loop exit
PB: predicated region body
PF: predicated region fallthrough
CT: control target
= control target key end

     0   :  { %8 = vsyncpa [#allocation3], 0  ;;  %s1932_s0 = inlined_call_operand.hbm [shape: s32[2,256], index: 0, kind: input, shape index: {}]   ;;  %s1933_s1 = inlined_call_operand.hbm [shape: f32[8,256], index: 1, kind: input, shape index: {}]   ;;  %s1934_s2 = inlined_call_operand.hbm [shape: f32[4,8,8], index: 2, kind: input, shape index: {}]   ;;  %s1935_s3 = inlined_call_operand.hbm [shape: f32[8,256], index: 3, kind: output, shape index: {}]  }
   0x1   :  { %9 = vsyncpa [#allocation6], 0 }
   0x2   :  { %10 = vsyncpa [#allocation4], 0  ;;  %s1168_s12 = smov [#allocation5]   ;;  %s1169_s14 = smov [#allocation2]  }
   0x3   :  { %s27_s13 = sshll.u32 %s1168_s12, 4  ;;  %s17_s15 = sshll.u32 %s1169_s14, 4  ;;  %s28_s13 = int_to_ptr.vmem [resolvable:$true] %s27_s13  ;;  %s18_s15 = int_to_ptr.vmem [resolvable:$true] %s17_s15 }
   0x4   :  { %s1090_s16 = scalar_lea.vmem %s28_s13, 256  ;;  %p1095_p1 = scmp.lt.s32.totalorder %s28_s13, %s28_s13 }
   0x5   :  { %p1091_p0 = scmp.ne.s32.totalorder %s28_s13, %s1090_s16  ;;  %p1096_p2 = scmp.lt.s32.totalorder %s1090_s16, %s1090_s16 }
   0x7   :  { %p1097_p3 = por %p1096_p2, %p1095_p1 }
   0x9   :  { %p1098_p4 = pnand %p1097_p3, %p1091_p0 }
   0xb   :  { %1101 = shalt.err (!%p1098_p4)
}
   0xc   :  { %30 = dma.hbm_to_vmem [thread:$0]  %s1933_s1, 256, %s28_s13, [#allocation6]  }
   0xd   :  { %s1110_s19 = scalar_lea.vmem %s18_s15, 64  ;;  %p1115_p6 = scmp.lt.s32.totalorder %s18_s15, %s18_s15 }
   0xe   :  { %p1111_p5 = scmp.ne.s32.totalorder %s18_s15, %s1110_s19  ;;  %p1116_p7 = scmp.lt.s32.totalorder %s1110_s19, %s1110_s19 }
  0x10   :  { %p1117_p8 = por %p1116_p7, %p1115_p6 }
  0x12   :  { %p1118_p9 = pnand %p1117_p8, %p1111_p5 }
  0x14   :  { %1121 = shalt.err (!%p1118_p9)
}
  0x15   :  { %20 = dma.hbm_to_vmem [thread:$0]  %s1932_s0, 64, %s18_s15, [#allocation3]  }
  0x16   :  { %s1170_s22 = smov [#allocation7]  }
  0x17   :  { %s36_s23 = sshll.u32 %s1170_s22, 4  ;;  %s37_s23 = int_to_ptr.vmem [resolvable:$true] %s36_s23 }
  0x18   :  { %s1130_s24 = scalar_lea.vmem %s37_s23, 512  ;;  %p1135_p11 = scmp.lt.s32.totalorder %s37_s23, %s37_s23 }
  0x19   :  { %p1131_p10 = scmp.ne.s32.totalorder %s37_s23, %s1130_s24  ;;  %p1136_p12 = scmp.lt.s32.totalorder %s1130_s24, %s1130_s24 }
  0x1b   :  { %p1137_p13 = por %p1136_p12, %p1135_p11 }
  0x1d   :  { %p1138_p0 = pnand %p1137_p13, %p1131_p10 }
  0x1f   :  { %1141 = shalt.err (!%p1138_p0)
}
  0x20   :  { %s1171_s1 = smov 128   ;;  %s1172_s25 = smov 8  }
  0x21   :  { %42 = dma.hbm_to_vmem [thread:$0]  %s1934_s2, 512, %s37_s23, [#allocation6], %s1171_s1, %s1171_s1, %s1172_s25  }
  0x22   :  { %1162 = dma.done.wait [#allocation3], 64  }
  0x23   :  { %1163 = vsyncadd [#allocation3], 4294967232 }
  0x24   :  { %1164 = dma.done.wait [#allocation6], 768  }
  0x25   :  { %1165 = vsyncadd [#allocation6], 4294966528  ;;  %v56_v0 = vlaneseq  ;;  %v1173_v1 = vmov 1983009808   ;;  %v52_v9 = vld [vmem:[#allocation2] sm:$0xf] }
  0x26   :  { %v54_v2 = vunpack.c.l.s4 %v1173_v1  ;;  %s1174_s0 = smov 127   ;;  %s1175_s2 = smov 1   ;;  %v1231_v15 = vld [vmem:[#allocation5 + $0x8] sm:$0xff]  ;;  %v1233_v16 = vld [vmem:[#allocation5] sm:$0xff]  ;;  %v1182_v48 = vmov 0  }
  0x27   :  { %v57_v3 = vshrl.u32 %v56_v0, 7  ;;  %s1176_s28 = smov 2   ;;  %s1177_s29 = smov 126   ;;  %v1259_v17 = vand.u32 127, %v56_v0 }
  0x28   :  { %v55_v4 = vunpack.c.0.s8 %v54_v2  ;;  %s1178_s30 = smov 16   ;;  %s1179_s4 = smov 112  }
  0x29   :  { %v1214_v5 = vsub.s32 0, %v57_v3  ;;  %v76_v6 = vsub.s32 2, %v57_v3  ;;  %v86_v8 = vsub.s32 3, %v57_v3  ;;  %s1180_s5 = smov 32   ;;  %s1181_s6 = smov 96   ;;  %v1261_v18 = vsub.s32 1, %v57_v3 }
  0x2a   :  { %v58_v7 = vsub.s32 %v55_v4, %v57_v3  ;;  %vm1936_vm0 = vcmp.lt.s32.totalorder %v1259_v17, 127  ;;  %vm1937_vm1 = vcmp.lt.s32.totalorder %v1259_v17, 1  ;;  %vm1939_vm2 = vcmp.lt.s32.totalorder %v1259_v17, 2  ;;  %s1184_s7 = smov [#allocation8]  }
  0x2b   :  { %v1217_v11 = vrot.slane %v52_v9, %v1214_v5  ;;  %v1219_v12 = vrot.slane %v52_v9, %v76_v6  ;;  %v1221_v13 = vrot.slane %v52_v9, %v86_v8  ;;  %v1264_v21 = vrot.slane %v52_v9, %v1261_v18  ;;  %s1033_s8 = sshll.u32 %s1184_s7, 4  ;;  %s1034_s8 = int_to_ptr.vmem [resolvable:$true] %s1033_s8 }
  0x2c   :  { %v59_v10 = vrot.slane %v52_v9, %v58_v7  ;;  %vm1938_vm4 = vcmp.lt.s32.totalorder %v1259_v17, 126  ;;  %s1142_s9 = scalar_lea.vmem %s1034_s8, 256  ;;  %p1147_p2 = scmp.lt.s32.totalorder %s1034_s8, %s1034_s8 }
  0x2d   :  { %p1143_p1 = scmp.ne.s32.totalorder %s1034_s8, %s1142_s9  ;;  %p1148_p3 = scmp.lt.s32.totalorder %s1142_s9, %s1142_s9 }
  0x2e   :  { %118 = vrot.lane.b32.xlu1 %v59_v10, %s1174_s0  ;;  %61 = vrot.lane.b32.xlu0 %v59_v10, %s1175_s2  ;;  %v60_v14 = vcombine.high %v59_v10, %v59_v10 }
  0x2f   :  { %p1149_p4 = por %p1148_p3, %p1147_p2 }
  0x31   :  { %p1150_p5 = pnand %p1149_p4, %p1143_p1 }
  0x32   :  { %120 = vrot.lane.b32.xlu1 %v60_v14, %s1174_s0  ;;  %63 = vrot.lane.b32.xlu0 %v60_v14, %s1175_s2 }
  0x36   :  { %159 = vrot.lane.b32.xlu1 %v60_v14, %s1176_s28  ;;  %157 = vrot.lane.b32.xlu0 %v59_v10, %s1176_s28 }
  0x3a   :  { %198 = vrot.lane.b32.xlu1 %v60_v14, %s1177_s29  ;;  %196 = vrot.lane.b32.xlu0 %v59_v10, %s1177_s29 }
  0x3e   :  { %395 = vrot.lane.b32.xlu1 %v1231_v15, %s1175_s2  ;;  %393 = vrot.lane.b32.xlu0 %v1233_v16, %s1175_s2 }
  0x42   :  { %405 = vrot.lane.b32.xlu1 %v1231_v15, %s1174_s0  ;;  %403 = vrot.lane.b32.xlu0 %v1233_v16, %s1174_s0 }
  0x46   :  { %415 = vrot.lane.b32.xlu1 %v1231_v15, %s1176_s28  ;;  %413 = vrot.lane.b32.xlu0 %v1233_v16, %s1176_s28 }
  0x4a   :  { %425 = vrot.lane.b32.xlu1 %v1231_v15, %s1177_s29  ;;  %423 = vrot.lane.b32.xlu0 %v1233_v16, %s1177_s29 }
  0x4e   :  { %237 = vrot.lane.b32.xlu1 %v60_v14, %s1178_s30  ;;  %235 = vrot.lane.b32.xlu0 %v59_v10, %s1178_s30 }
  0x52   :  { %276 = vrot.lane.b32.xlu1 %v60_v14, %s1179_s4  ;;  %274 = vrot.lane.b32.xlu0 %v59_v10, %s1179_s4 }
  0x56   :  { %315 = vrot.lane.b32.xlu1 %v60_v14, %s1180_s5  ;;  %313 = vrot.lane.b32.xlu0 %v59_v10, %s1180_s5 }
  0x5a   :  { %354 = vrot.lane.b32.xlu1 %v60_v14, %s1181_s6  ;;  %352 = vrot.lane.b32.xlu0 %v59_v10, %s1181_s6 }
  0xa0   :  { %v119_v19 = vpop.permute.xlu1 %118  ;;  %v62_v20 = vpop.permute.xlu0 %61 }
  0xa4   :  { %v121_v22 = vpop.permute.xlu1 %120  ;;  %v64_v23 = vpop.permute.xlu0 %63 }
  0xa5   :  { %v123_v24 = vsel %vm1936_vm0, %v119_v19, %v121_v22  ;;  %v124_v25 = vsel %vm1936_vm0, %v121_v22, %v119_v19  ;;  %v1274_v26 = vsel %vm1937_vm1, %v62_v20, %v64_v23  ;;  %v69_v27 = vsel %vm1937_vm1, %v64_v23, %v62_v20 }
  0xa6   :  { %v127_v28 = vsub.s32 %v123_v24, %v1264_v21  ;;  %v128_v29 = vsub.s32 %v124_v25, %v1221_v13  ;;  %v88_v30 = vsub.s32 %v69_v27, %v1264_v21  ;;  %v89_v31 = vsub.s32 %v1274_v26, %v1221_v13 }
  0xa7   :  { %vm125_vm3 = vcmp.eq.s32.totalorder %v123_v24, %v1217_v11  ;;  %vm126_vm5 = vcmp.eq.s32.totalorder %v124_v25, %v1219_v12  ;;  %vm78_vm8 = vcmp.eq.s32.totalorder %v69_v27, %v1217_v11  ;;  %vm79_vm13 = vcmp.eq.s32.totalorder %v1274_v26, %v1219_v12 }
  0xa8   :  { %v130_v32 = vsub.s32 0, %v127_v28  ;;  %v133_v33 = vsub.s32 0, %v128_v29  ;;  %v160_v34 = vpop.permute.xlu1 %159  ;;  %v158_v35 = vpop.permute.xlu0 %157  ;;  %v91_v36 = vsub.s32 0, %v88_v30  ;;  %v94_v37 = vsub.s32 0, %v89_v31 }
  0xa9   :  { %v1286_v38 = vsel %vm1939_vm2, %v158_v35, %v160_v34  ;;  %v1290_v39 = vsel %vm1939_vm2, %v160_v34, %v158_v35 }
  0xaa   :  { %v1045_v40 = vmin.u32 %v130_v32, %v127_v28  ;;  %v1046_v41 = vmin.u32 %v133_v33, %v128_v29  ;;  %v1043_v42 = vmin.u32 %v91_v36, %v88_v30  ;;  %v1044_v43 = vmin.u32 %v94_v37, %v89_v31 }
  0xab   :  { %v166_v44 = vsub.s32 %v1290_v39, %v1264_v21  ;;  %v167_v45 = vsub.s32 %v1286_v38, %v1221_v13 }
  0xac   :  { %vm135_vm6 = vcmp.le.s32.totalorder %v1045_v40, 2  ;;  %vm136_vm7 = vcmp.le.s32.totalorder %v1046_v41, 2  ;;  %v199_v46 = vpop.permute.xlu1 %198  ;;  %v197_v47 = vpop.permute.xlu0 %196  ;;  %vm96_vm9 = vcmp.le.s32.totalorder %v1043_v42, 2  ;;  %vm97_vm10 = vcmp.le.s32.totalorder %v1044_v43, 2 }
  0xad   :  { %v137_v49 = vsel %vm135_vm6, 1, %v1182_v48  ;;  %v138_v50 = vsel %vm136_vm7, 1, %v1182_v48  ;;  %v98_v53 = vsel %vm96_vm9, 1, %v1182_v48  ;;  %v99_v54 = vsel %vm97_vm10, 1, %v1182_v48 }
  0xae   :  { %v139_v51 = vrot.slane %v137_v49, 1  ;;  %v140_v52 = vrot.slane %v138_v50, 1  ;;  %v100_v55 = vrot.slane %v98_v53, 1  ;;  %v101_v56 = vrot.slane %v99_v54, 1 }
  0xaf   :  { %v169_v57 = vsub.s32 0, %v166_v44  ;;  %v172_v58 = vsub.s32 0, %v167_v45  ;;  %v1308_v59 = vsel %vm1938_vm4, %v197_v47, %v199_v46  ;;  %vm164_vm9 = vcmp.eq.s32.totalorder %v1290_v39, %v1217_v11 }
  0xb0   :  { %vm141_vm11 = vcmp.ne.s32.totalorder %v139_v51, 0  ;;  %vm142_vm12 = vcmp.ne.s32.totalorder %v140_v52, 0  ;;  %v396_v60 = vpop.permute.xlu1 %395  ;;  %v394_v61 = vpop.permute.xlu0 %393  ;;  %vm102_vm15 = vcmp.ne.s32.totalorder %v100_v55, 0  ;;  %vm103_vm6 = vcmp.ne.s32.totalorder %v101_v56, 0 }
  0xb1   :  { %vm143_vm14 = vmand %vm125_vm3, %vm141_vm11  ;;  %v1047_v62 = vmin.u32 %v169_v57, %v166_v44  ;;  %v1048_v63 = vmin.u32 %v172_v58, %v167_v45  ;;  %v1319_v1 = vsel %vm1938_vm4, %v199_v46, %v197_v47  ;;  %v205_v2 = vsub.s32 %v1308_v59, %v1264_v21 }
  0xb2   :  { %vm144_vm7 = vmand %vm126_vm5, %vm142_vm12  ;;  %v145_v0 = vsel %vm143_vm14, 1, %v1182_v48  ;;  %v206_v26 = vsub.s32 %v1319_v1, %v1221_v13  ;;  %v397_v29 = vsel %vm1937_vm1, %v394_v61, %v396_v60  ;;  %v398_v32 = vsel %vm1937_vm1, %v396_v60, %v394_v61 }
  0xb3   :  { %v146_v3 = vsel %vm144_vm7, 1, %v1182_v48  ;;  %v150_v4 = vrot.slane %v145_v0, %v1214_v5  ;;  %vm104_vm3 = vmand %vm78_vm8, %vm102_vm15  ;;  %vm174_vm5 = vcmp.le.s32.totalorder %v1047_v62, 2  ;;  %vm175_vm10 = vcmp.le.s32.totalorder %v1048_v63, 2 }
  0xb4   :  { %v154_v6 = vrot.slane %v146_v3, %v1214_v5  ;;  %vm105_vm11 = vmand %vm79_vm13, %vm103_vm6  ;;  %v106_v7 = vsel %vm104_vm3, 1, %v1182_v48  ;;  %v176_v8 = vsel %vm174_vm5, 1, %v1182_v48  ;;  %v177_v9 = vsel %vm175_vm10, 1, %v1182_v48  ;;  %v406_v10 = vpop.permute.xlu1 %405  ;;  %v404_v14 = vpop.permute.xlu0 %403 }
  0xb5   :  { %v107_v19 = vsel %vm105_vm11, 1, %v1182_v48  ;;  %v111_v20 = vrot.slane %v106_v7, %v1214_v5  ;;  %vm165_vm8 = vcmp.eq.s32.totalorder %v1286_v38, %v1219_v12  ;;  %v178_v22 = vrot.slane %v176_v8, 1 }
  0xb6   :  { %vm1338_vm12 = vcmp.eq.s32.totalorder %v150_v4, 1  ;;  %v115_v24 = vrot.slane %v107_v19, %v1214_v5  ;;  %v179_v25 = vrot.slane %v177_v9, 1  ;;  %vm1942_vm13 = vcmp.lt.s32.totalorder %v1259_v17, 16 }
  0xb7   :  { %vm1346_vm14 = vcmp.eq.s32.totalorder %v111_v20, 1  ;;  %vm180_vm15 = vcmp.ne.s32.totalorder %v178_v22, 0  ;;  %v208_v28 = vsub.s32 0, %v205_v2  ;;  %v211_v31 = vsub.s32 0, %v206_v26 }
  0xb8   :  { %vm1352_vm6 = vcmp.eq.s32.totalorder %v115_v24, 1  ;;  %vm181_vm7 = vcmp.ne.s32.totalorder %v179_v25, 0  ;;  %vm182_vm3 = vmand %vm164_vm9, %vm180_vm15  ;;  %v416_v33 = vpop.permute.xlu1 %415  ;;  %v414_v34 = vpop.permute.xlu0 %413  ;;  %v399_v37 = vsel %vm1346_vm14, %v398_v32, %v1233_v16  ;;  %vm1371_vm9 = vcmp.eq.s32.totalorder %v154_v6, 1 }
  0xb9   :  { %vm183_vm5 = vmand %vm165_vm8, %vm181_vm7  ;;  %v184_v35 = vsel %vm182_vm3, 1, %v1182_v48  ;;  %v1049_v36 = vmin.u32 %v208_v28, %v205_v2  ;;  %v400_v39 = vsel %vm1352_vm6, %v397_v29, %v1231_v15  ;;  %v1050_v42 = vmin.u32 %v211_v31, %v206_v26 }
  0xba   :  { %v185_v41 = vsel %vm183_vm5, 1, %v1182_v48  ;;  %v189_v38 = vrot.slane %v184_v35, %v1214_v5  ;;  %v401_v44 = vmax.f32 %v1233_v16, %v399_v37  ;;  %v402_v45 = vmax.f32 %v1231_v15, %v400_v39 }
  0xbb   :  { %v193_v43 = vrot.slane %v185_v41, %v1214_v5  ;;  %vm213_vm10 = vcmp.le.s32.totalorder %v1049_v36, 2  ;;  %vm214_vm11 = vcmp.le.s32.totalorder %v1050_v42, 2  ;;  %v407_v47 = vsel %vm1936_vm0, %v404_v14, %v406_v10 }
  0xbc   :  { %v215_v46 = vsel %vm213_vm10, 1, %v1182_v48  ;;  %v408_v49 = vsel %vm1936_vm0, %v406_v10, %v404_v14  ;;  %v426_v50 = vpop.permute.xlu1 %425  ;;  %v424_v51 = vpop.permute.xlu0 %423  ;;  %vm203_vm8 = vcmp.eq.s32.totalorder %v1308_v59, %v1217_v11  ;;  %v216_v52 = vsel %vm214_vm11, 1, %v1182_v48 }
  0xbd   :  { %v217_v53 = vrot.slane %v215_v46, 1  ;;  %vm1941_vm15 = vcmp.lt.s32.totalorder %v1259_v17, 112  ;;  %vm1389_vm7 = vcmp.eq.s32.totalorder %v189_v38, 1  ;;  %v1964_v54 = vmov 0 }
  0xbe   :  { %v1965_v54 = vsel %vm1389_vm7, 4294967295, %v1964_v54  ;;  %vm1393_vm3 = vcmp.eq.s32.totalorder %v193_v43, 1  ;;  %v1966_v55 = vmov 0  ;;  %v218_v56 = vrot.slane %v216_v52, 1 }
  0xbf   :  { %v1967_v55 = vsel %vm1393_vm3, 4294967295, %v1966_v55  ;;  %v417_v57 = vsel %vm1939_vm2, %v414_v34, %v416_v33  ;;  %vm219_vm5 = vcmp.ne.s32.totalorder %v217_v53, 0  ;;  %v409_v58 = vsel %vm1338_vm12, %v407_v47, %v1233_v16 }
  0xc0   :  { %v410_v59 = vsel %vm1371_vm9, %v408_v49, %v1231_v15  ;;  %v418_v60 = vsel %vm1939_vm2, %v416_v33, %v414_v34  ;;  %vm204_vm10 = vcmp.eq.s32.totalorder %v1319_v1, %v1219_v12  ;;  %vm220_vm11 = vcmp.ne.s32.totalorder %v218_v56, 0  ;;  %vm221_vm0 = vmand %vm203_vm8, %vm219_vm5  ;;  %v238_v63 = vpop.permute.xlu1 %237  ;;  %v236_v0 = vpop.permute.xlu0 %235 }
  0xc1   :  { %v411_v61 = vmax.f32 %v401_v44, %v409_v58  ;;  %v412_v62 = vmax.f32 %v402_v45, %v410_v59  ;;  %vm222_vm1 = vmand %vm204_vm10, %vm220_vm11  ;;  %v223_v2 = vsel %vm221_vm0, 1, %v1182_v48  ;;  %v419_v3 = vsel %vm1389_vm7, %v418_v60, %v1233_v16 }
  0xc2   :  { %v420_v4 = vsel %vm1393_vm3, %v417_v57, %v1231_v15  ;;  %v240_v1 = vsel %vm1942_vm13, %v236_v0, %v238_v63  ;;  %v224_v6 = vsel %vm222_vm1, 1, %v1182_v48  ;;  %v228_v7 = vrot.slane %v223_v2, %v1214_v5 }
  0xc3   :  { %v427_v8 = vsel %vm1938_vm4, %v424_v51, %v426_v50  ;;  %v241_v9 = vsel %vm1942_vm13, %v238_v63, %v236_v0  ;;  %v232_v10 = vrot.slane %v224_v6, %v1214_v5  ;;  %v428_v14 = vsel %vm1938_vm4, %v426_v50, %v424_v51 }
  0xc4   :  { %v244_v19 = vsub.s32 %v241_v9, %v1217_v11  ;;  %v245_v20 = vsub.s32 %v240_v1, %v1219_v12  ;;  %vm1429_vm0 = vcmp.eq.s32.totalorder %v228_v7, 1  ;;  %v1968_v22 = vmov 0  ;;  %v277_v26 = vpop.permute.xlu1 %276  ;;  %v275_v28 = vpop.permute.xlu0 %274 }
  0xc5   :  { %v1969_v22 = vsel %vm1429_vm0, 4294967295, %v1968_v22  ;;  %v421_v24 = vmax.f32 %v411_v61, %v419_v3  ;;  %v422_v25 = vmax.f32 %v412_v62, %v420_v4  ;;  %vm1940_vm1 = vcmp.lt.s32.totalorder %v1259_v17, 32 }
  0xc6   :  { %vm1434_vm8 = vcmp.eq.s32.totalorder %v232_v10, 1  ;;  %v1970_v29 = vmov 0  ;;  %v429_v5 = vsel %vm1429_vm0, %v427_v8, %v1233_v16  ;;  %v247_v31 = vsub.s32 0, %v244_v19 }
  0xc7   :  { %v1971_v29 = vsel %vm1434_vm8, 4294967295, %v1970_v29  ;;  %v250_v32 = vsub.s32 0, %v245_v20  ;;  %v430_v33 = vsel %vm1434_vm8, %v428_v14, %v1231_v15  ;;  %v1444_v34 = vmax.f32 %v421_v24, %v429_v5 }
  0xc8   :  { %v279_v35 = vsel %vm1941_vm15, %v275_v28, %v277_v26  ;;  %v280_v36 = vsel %vm1941_vm15, %v277_v26, %v275_v28  ;;  %v1450_v37 = vmax.f32 %v422_v25, %v430_v33  ;;  %v1051_v39 = vmin.u32 %v247_v31, %v244_v19  ;;  %v316_v15 = vpop.permute.xlu1 %315  ;;  %v314_v42 = vpop.permute.xlu0 %313 }
  0xc9   :  { %v1052_v41 = vmin.u32 %v250_v32, %v245_v20  ;;  %433 = vrot.lane.b32.xlu0 %v1444_v34, %s1178_s30  ;;  %v283_v16 = vsub.s32 %v279_v35, %v1217_v11  ;;  %v284_v38 = vsub.s32 %v280_v36, %v1219_v12  ;;  %v1461_v43 = vsel %vm1940_vm1, %v314_v42, %v316_v15 }
  0xca   :  { %435 = vrot.lane.b32.xlu1 %v1450_v37, %s1178_s30  ;;  %vm252_vm10 = vcmp.le.s32.totalorder %v1051_v39, 2  ;;  %v1465_v44 = vsel %vm1940_vm1, %v316_v15, %v314_v42  ;;  %vm242_vm4 = vcmp.eq.s32.totalorder %v241_v9, %v1264_v21  ;;  %vm243_vm2 = vcmp.eq.s32.totalorder %v240_v1, %v1221_v13 }
  0xcb   :  { %vm253_vm11 = vcmp.le.s32.totalorder %v1052_v41, 2  ;;  %v254_v45 = vsel %vm252_vm10, 1, %v1182_v48  ;;  %v286_v47 = vsub.s32 0, %v283_v16  ;;  %v289_v49 = vsub.s32 0, %v284_v38 }
  0xcc   :  { %v255_v46 = vsel %vm253_vm11, 1, %v1182_v48  ;;  %v256_v50 = vrot.slane %v254_v45, 7  ;;  %v322_v56 = vsub.s32 %v1465_v44, %v1217_v11  ;;  %v323_v57 = vsub.s32 %v1461_v43, %v1219_v12  ;;  %v355_v58 = vpop.permute.xlu1 %354  ;;  %v353_v59 = vpop.permute.xlu0 %352 }
  0xcd   :  { %v257_v51 = vrot.slane %v255_v46, 7  ;;  %443 = vrot.lane.b32.xlu0 %v1444_v34, %s1179_s4  ;;  %v1053_v52 = vmin.u32 %v286_v47, %v283_v16  ;;  %v1054_v53 = vmin.u32 %v289_v49, %v284_v38  ;;  %vm281_vm1 = vcmp.eq.s32.totalorder %v279_v35, %v1264_v21 }
  0xce   :  { %445 = vrot.lane.b32.xlu1 %v1450_v37, %s1179_s4  ;;  %vm258_vm10 = vcmp.ne.s32.totalorder %v256_v50, 0  ;;  %v325_v60 = vsub.s32 0, %v322_v56  ;;  %v328_v61 = vsub.s32 0, %v323_v57  ;;  %vm1972_vm0 = vcmp.lt.s32.totalorder %v1259_v17, 96 }
  0xcf   :  { %vm259_vm11 = vcmp.ne.s32.totalorder %v257_v51, 0  ;;  %vm260_vm15 = vmand %vm242_vm4, %vm258_vm10  ;;  %vm291_vm13 = vcmp.le.s32.totalorder %v1053_v52, 2  ;;  %vm292_vm5 = vcmp.le.s32.totalorder %v1054_v53, 2  ;;  %v357_v2 = vsel %vm1972_vm0, %v353_v59, %v355_v58 }
  0xd0   :  { %vm261_vm8 = vmand %vm243_vm2, %vm259_vm11  ;;  %v1485_v62 = vsel %vm260_vm15, 1, %v1182_v48  ;;  %v293_v63 = vsel %vm291_vm13, 1, %v1182_v48  ;;  %v294_v0 = vsel %vm292_vm5, 1, %v1182_v48  ;;  %vm282_vm4 = vcmp.eq.s32.totalorder %v280_v36, %v1221_v13 }
  0xd1   :  { %453 = vrot.lane.b32.xlu0 %v1444_v34, %s1180_s5  ;;  %v1494_v3 = vsel %vm261_vm8, 1, %v1182_v48  ;;  %v295_v4 = vrot.slane %v293_v63, 7  ;;  %v296_v6 = vrot.slane %v294_v0, 7  ;;  %vm1973_vm2 = vmmov %vm1972_vm0  ;;  %v1055_v7 = vmin.u32 %v325_v60, %v322_v56 }
  0xd2   :  { %v358_v1 = vsel %vm1973_vm2, %v355_v58, %v353_v59  ;;  %455 = vrot.lane.b32.xlu1 %v1450_v37, %s1180_s5  ;;  %v1056_v8 = vmin.u32 %v328_v61, %v323_v57  ;;  %v361_v9 = vsub.s32 %v357_v2, %v1217_v11  ;;  %vm321_vm11 = vcmp.eq.s32.totalorder %v1461_v43, %v1221_v13 }
  0xd3   :  { %vm297_vm13 = vcmp.ne.s32.totalorder %v295_v4, 0  ;;  %vm298_vm15 = vcmp.ne.s32.totalorder %v296_v6, 0  ;;  %vm330_vm8 = vcmp.le.s32.totalorder %v1055_v7, 2  ;;  %v362_v10 = vsub.s32 %v358_v1, %v1219_v12 }
  0xd4   :  { %vm299_vm0 = vmand %vm281_vm1, %vm297_vm13  ;;  %vm331_vm5 = vcmp.le.s32.totalorder %v1056_v8, 2  ;;  %v332_v19 = vsel %vm330_vm8, 1, %v1182_v48  ;;  %v364_v24 = vsub.s32 0, %v361_v9  ;;  %vm320_vm1 = vcmp.eq.s32.totalorder %v1465_v44, %v1264_v21 }
  0xd5   :  { %463 = vrot.lane.b32.xlu0 %v1444_v34, %s1181_s6  ;;  %vm300_vm10 = vmand %vm282_vm4, %vm298_vm15  ;;  %v301_v14 = vsel %vm299_vm0, 1, %v1182_v48  ;;  %v333_v20 = vsel %vm331_vm5, 1, %v1182_v48  ;;  %v334_v12 = vrot.slane %v332_v19, 7  ;;  %v367_v28 = vsub.s32 0, %v362_v10 }
  0xd6   :  { %465 = vrot.lane.b32.xlu1 %v1450_v37, %s1181_s6  ;;  %v302_v11 = vsel %vm300_vm10, 1, %v1182_v48  ;;  %v335_v25 = vrot.slane %v333_v20, 7  ;;  %v1057_v26 = vmin.u32 %v364_v24, %v361_v9  ;;  %v1183_v5 = vmov 0.0  }
  0xd7   :  { %vm336_vm2 = vcmp.ne.s32.totalorder %v334_v12, 0  ;;  %542 = vmatprep.mubr.f32.mxu0 %v1183_v5  ;;  %700 = vmatprep.mubr.f32.mxu1 %v1183_v5  ;;  %v1058_v31 = vmin.u32 %v367_v28, %v362_v10  ;;  %vm359_vm8 = vcmp.eq.s32.totalorder %v357_v2, %v1264_v21  ;;  %vm360_vm10 = vcmp.eq.s32.totalorder %v358_v1, %v1221_v13 }
  0xd8   :  { %vm337_vm4 = vcmp.ne.s32.totalorder %v335_v25, 0  ;;  %vm338_vm13 = vmand %vm320_vm1, %vm336_vm2  ;;  %vm369_vm15 = vcmp.le.s32.totalorder %v1057_v26, 2  ;;  %v267_v21 = vrot.slane %v1485_v62, %v1261_v18  ;;  %v271_v43 = vrot.slane %v1494_v3, %v1261_v18 }
  0xd9   :  { %vm339_vm0 = vmand %vm321_vm11, %vm337_vm4  ;;  %v340_v32 = vsel %vm338_vm13, 1, %v1182_v48  ;;  %v371_v33 = vsel %vm369_vm15, 1, %v1182_v48  ;;  %vm370_vm5 = vcmp.le.s32.totalorder %v1058_v31, 2  ;;  %v306_v44 = vrot.slane %v301_v14, %v1261_v18 }
  0xda   :  { %v341_v35 = vsel %vm339_vm0, 1, %v1182_v48  ;;  %v373_v36 = vrot.slane %v371_v33, 7  ;;  %v372_v39 = vsel %vm370_vm5, 1, %v1182_v48  ;;  %v310_v13 = vrot.slane %v302_v11, %v1261_v18 }
  0xdb   :  { %v374_v41 = vrot.slane %v372_v39, 7  ;;  %v345_v45 = vrot.slane %v340_v32, %v1261_v18  ;;  %v349_v46 = vrot.slane %v341_v35, %v1261_v18  ;;  %vm1539_vm13 = vcmp.eq.s32.totalorder %v267_v21, 1  ;;  %v473_v39 = vld [vmem:[#allocation7] sm:$0xff] }
  0xdc   :  { %vm375_vm3 = vcmp.ne.s32.totalorder %v373_v36, 0  ;;  %vm1543_vm15 = vcmp.eq.s32.totalorder %v271_v43, 1  ;;  %vm1980_vm0 = vcmp.lt.s32.totalorder %v1259_v17, 112  ;;  %vm1557_vm5 = vcmp.eq.s32.totalorder %v306_v44, 1 }
  0xdd   :  { %vm377_vm1 = vmand %vm359_vm8, %vm375_vm3  ;;  %vm376_vm2 = vcmp.ne.s32.totalorder %v374_v41, 0  ;;  %vm1974_vm3 = vcmp.lt.s32.totalorder %v1259_v17, 16  ;;  %v1992_v24 = vmov 0  ;;  %v1994_v12 = vmov 0 }
  0xde   :  { %v379_v16 = vsel %vm377_vm1, 1, %v1182_v48  ;;  %vm378_vm11 = vmand %vm360_vm10, %vm376_vm2  ;;  %vm1561_vm10 = vcmp.eq.s32.totalorder %v310_v13, 1  ;;  %vm1565_vm1 = vcmp.eq.s32.totalorder %v345_v45, 1  ;;  %vm1569_vm2 = vcmp.eq.s32.totalorder %v349_v46, 1 }
  0xdf   :  { %v380_v38 = vsel %vm378_vm11, 1, %v1182_v48  ;;  %vm1975_vm4 = vmmov %vm1974_vm3  ;;  %v384_v0 = vrot.slane %v379_v16, %v1261_v18  ;;  %vm1990_vm11 = vcmp.lt.s32.totalorder %v1259_v17, 32 }
  0xe0   :  { %vm1981_vm8 = vmmov %vm1980_vm0  ;;  %v388_v6 = vrot.slane %v380_v38, %v1261_v18 }
 0x13b   :  { %v434_v15 = vpop.permute.xlu0 %433 }
 0x13c   :  { %v436_v42 = vpop.permute.xlu1 %435 }
 0x13d   :  { %v437_v47 = vsel %vm1974_vm3, %v434_v15, %v436_v42  ;;  %v438_v48 = vsel %vm1975_vm4, %v436_v42, %v434_v15  ;;  %vm1991_vm3 = vmmov %vm1990_vm11  ;;  %vm1593_vm4 = vcmp.eq.s32.totalorder %v384_v0, 1 }
 0x13e   :  { %v439_v57 = vsel %vm1539_vm13, %v438_v48, %v1444_v34  ;;  %v440_v58 = vsel %vm1543_vm15, %v437_v47, %v1450_v37  ;;  %v1993_v24 = vsel %vm1593_vm4, 4294967295, %v1992_v24 }
 0x13f   :  { %v444_v49 = vpop.permute.xlu0 %443  ;;  %v441_v1 = vmax.f32 %v1444_v34, %v439_v57  ;;  %v442_v7 = vmax.f32 %v1450_v37, %v440_v58 }
 0x140   :  { %v446_v50 = vpop.permute.xlu1 %445 }
 0x141   :  { %v447_v53 = vsel %vm1980_vm0, %v444_v49, %v446_v50  ;;  %v448_v56 = vsel %vm1981_vm8, %v446_v50, %v444_v49  ;;  %vm1597_vm0 = vcmp.eq.s32.totalorder %v388_v6, 1  ;;  %vm1996_vm8 = vcmp.lt.s32.totalorder %v1259_v17, 96 }
 0x142   :  { %v449_v2 = vsel %vm1557_vm5, %v447_v53, %v1444_v34  ;;  %v450_v3 = vsel %vm1561_vm10, %v448_v56, %v1450_v37  ;;  %v1995_v12 = vsel %vm1597_vm0, 4294967295, %v1994_v12 }
 0x143   :  { %v454_v63 = vpop.permute.xlu0 %453  ;;  %v451_v19 = vmax.f32 %v441_v1, %v449_v2  ;;  %v452_v20 = vmax.f32 %v442_v7, %v450_v3 }
 0x144   :  { %v456_v4 = vpop.permute.xlu1 %455 }
 0x145   :  { %v457_v8 = vsel %vm1990_vm11, %v454_v63, %v456_v4  ;;  %v458_v9 = vsel %vm1991_vm3, %v456_v4, %v454_v63  ;;  %vm1997_vm11 = vmmov %vm1996_vm8  ;;  %vm1949_vm3 = vcmask 64512  }
 0x146   :  { %v459_v10 = vsel %vm1565_vm1, %v458_v9, %v1444_v34  ;;  %v460_v14 = vsel %vm1569_vm2, %v457_v8, %v1450_v37 }
 0x147   :  { %v464_v18 = vpop.permute.xlu0 %463  ;;  %v462_v28 = vmax.f32 %v452_v20, %v460_v14  ;;  %v461_v31 = vmax.f32 %v451_v19, %v459_v10 }
 0x148   :  { %v466_v11 = vpop.permute.xlu1 %465 }
 0x149   :  { %v467_v25 = vsel %vm1996_vm8, %v464_v18, %v466_v11  ;;  %v468_v26 = vsel %vm1997_vm11, %v466_v11, %v464_v18  ;;  %vm1998_vm8 = vcmp.lt.s32.totalorder %v1259_v17, 1 }
 0x14a   :  { %v470_v32 = vsel %vm1597_vm0, %v468_v26, %v1450_v37  ;;  %v469_v33 = vsel %vm1593_vm4, %v467_v25, %v1444_v34  ;;  %vm1999_vm11 = vmmov %vm1998_vm8 }
 0x14b   :  { %v472_v35 = vmax.f32 %v462_v28, %v470_v32  ;;  %v471_v36 = vmax.f32 %v461_v31, %v469_v33 }
 0x14d   :  { %508 = vmatprep.subr.mxu0 %v472_v35 }
 0x14e   :  { %509 = vmatpush1.msra.mxu0 %v471_v36 }
 0x14f   :  { %1059 = vmatmul.mubr.msk.f32.vlgmr.msra.gmra.mxu0 %vm1949_vm3, %v473_v39  ;;  %vm2000_vm3 = vcmp.lt.s32.totalorder %v1259_v17, 127 }
 0x150   :  { %858 = vmatprep.mubr.f32.mxu0 %v1183_v5  ;;  %vm2001_vm4 = vmmov %vm2000_vm3 }
 0x20f   :  { %v1613_v41 = vpop.f32.mrf.mxu0 }
 0x210   :  { %551 = vrot.lane.b32.xlu0 %v1613_v41, %s1175_s2 }
 0x211   :  { %v1617_v37 = vpop.f32.mrf.mxu0 }
 0x212   :  { %553 = vrot.lane.b32.xlu1 %v1617_v37, %s1175_s2 }
 0x214   :  { %561 = vrot.lane.b32.xlu0 %v1613_v41, %s1174_s0 }
 0x216   :  { %563 = vrot.lane.b32.xlu1 %v1617_v37, %s1174_s0 }
 0x218   :  { %571 = vrot.lane.b32.xlu0 %v1613_v41, %s1176_s28 }
 0x21a   :  { %573 = vrot.lane.b32.xlu1 %v1617_v37, %s1176_s28 }
 0x21c   :  { %581 = vrot.lane.b32.xlu0 %v1613_v41, %s1177_s29 }
 0x21e   :  { %583 = vrot.lane.b32.xlu1 %v1617_v37, %s1177_s29 }
 0x282   :  { %v552_v34 = vpop.permute.xlu0 %551 }
 0x284   :  { %v554_v16 = vpop.permute.xlu1 %553 }
 0x285   :  { %v555_v15 = vsel %vm1998_vm8, %v552_v34, %v554_v16  ;;  %v556_v42 = vsel %vm1999_vm11, %v554_v16, %v552_v34  ;;  %vm2004_vm8 = vnez %v1967_v55  ;;  %vm2005_vm11 = vcmp.lt.s32.totalorder %v1259_v17, 126 }
 0x286   :  { %v562_v38 = vpop.permute.xlu0 %561  ;;  %v557_v13 = vsel %vm1346_vm14, %v556_v42, %v1613_v41  ;;  %v558_v45 = vsel %vm1352_vm6, %v555_v15, %v1617_v37 }
 0x287   :  { %v559_v50 = vmax.f32 %v1613_v41, %v557_v13  ;;  %v560_v53 = vmax.f32 %v1617_v37, %v558_v45 }
 0x288   :  { %v564_v21 = vpop.permute.xlu1 %563 }
 0x289   :  { %v565_v43 = vsel %vm2000_vm3, %v562_v38, %v564_v21  ;;  %v566_v44 = vsel %vm2001_vm4, %v564_v21, %v562_v38  ;;  %vm2002_vm4 = vcmp.lt.s32.totalorder %v1259_v17, 2 }
 0x28a   :  { %v572_v46 = vpop.permute.xlu0 %571  ;;  %v567_v47 = vsel %vm1338_vm12, %v565_v43, %v1613_v41  ;;  %v568_v48 = vsel %vm1371_vm9, %v566_v44, %v1617_v37  ;;  %vm2003_vm3 = vmmov %vm2002_vm4 }
 0x28b   :  { %v569_v0 = vmax.f32 %v559_v50, %v567_v47  ;;  %v570_v2 = vmax.f32 %v560_v53, %v568_v48 }
 0x28c   :  { %v574_v49 = vpop.permute.xlu1 %573 }
 0x28d   :  { %v575_v56 = vsel %vm2002_vm4, %v572_v46, %v574_v49  ;;  %v576_v57 = vsel %vm2003_vm3, %v574_v49, %v572_v46  ;;  %vm2006_vm4 = vmmov %vm2005_vm11  ;;  %vm2007_vm3 = vnez %v1969_v22 }
 0x28e   :  { %v577_v58 = vsel %vm1389_vm7, %v576_v57, %v1613_v41  ;;  %v578_v63 = vsel %vm2004_vm8, %v575_v56, %v1617_v37  ;;  %v582_v3 = vpop.permute.xlu0 %581  ;;  %vm2008_vm7 = vnez %v1971_v29 }
 0x28f   :  { %v579_v6 = vmax.f32 %v569_v0, %v577_v58  ;;  %v580_v1 = vmax.f32 %v570_v2, %v578_v63  ;;  %v632_v0 = vld [vmem:[#allocation7 + $0x8] sm:$0xff] }
 0x290   :  { %v584_v4 = vpop.permute.xlu1 %583 }
 0x291   :  { %v585_v7 = vsel %vm2005_vm11, %v582_v3, %v584_v4  ;;  %v586_v8 = vsel %vm2006_vm4, %v584_v4, %v582_v3  ;;  %vm2009_vm11 = vcmp.lt.s32.totalorder %v1259_v17, 16 }
 0x292   :  { %v587_v9 = vsel %vm2007_vm3, %v585_v7, %v1613_v41  ;;  %v588_v10 = vsel %vm2008_vm7, %v586_v8, %v1617_v37  ;;  %vm2010_vm4 = vmmov %vm2009_vm11  ;;  %vm2011_vm7 = vcmp.lt.s32.totalorder %v1259_v17, 112 }
 0x293   :  { %v589_v14 = vmax.f32 %v579_v6, %v587_v9  ;;  %v590_v19 = vmax.f32 %v580_v1, %v588_v10  ;;  %vm2012_vm3 = vmmov %vm2011_vm7 }
 0x295   :  { %593 = vrot.lane.b32.xlu1 %v590_v19, %s1178_s30  ;;  %591 = vrot.lane.b32.xlu0 %v589_v14, %s1178_s30 }
 0x299   :  { %603 = vrot.lane.b32.xlu1 %v590_v19, %s1179_s4  ;;  %601 = vrot.lane.b32.xlu0 %v589_v14, %s1179_s4 }
 0x29d   :  { %613 = vrot.lane.b32.xlu1 %v590_v19, %s1180_s5  ;;  %611 = vrot.lane.b32.xlu0 %v589_v14, %s1180_s5 }
 0x2a1   :  { %623 = vrot.lane.b32.xlu1 %v590_v19, %s1181_s6  ;;  %621 = vrot.lane.b32.xlu0 %v589_v14, %s1181_s6 }
 0x307   :  { %v594_v18 = vpop.permute.xlu1 %593  ;;  %v592_v20 = vpop.permute.xlu0 %591 }
 0x308   :  { %v595_v11 = vsel %vm2009_vm11, %v592_v20, %v594_v18  ;;  %v596_v25 = vsel %vm2010_vm4, %v594_v18, %v592_v20  ;;  %vm2015_vm11 = vcmp.lt.s32.totalorder %v1259_v17, 96 }
 0x309   :  { %v597_v33 = vsel %vm1539_vm13, %v596_v25, %v589_v14  ;;  %v598_v35 = vsel %vm1543_vm15, %v595_v11, %v590_v19  ;;  %vm2016_vm4 = vmmov %vm2015_vm11 }
 0x30a   :  { %v599_v38 = vmax.f32 %v589_v14, %v597_v33  ;;  %v600_v15 = vmax.f32 %v590_v19, %v598_v35 }
 0x30b   :  { %v604_v26 = vpop.permute.xlu1 %603  ;;  %v602_v28 = vpop.permute.xlu0 %601 }
 0x30c   :  { %v605_v31 = vsel %vm2011_vm7, %v602_v28, %v604_v26  ;;  %v606_v32 = vsel %vm2012_vm3, %v604_v26, %v602_v28  ;;  %vm2013_vm7 = vcmp.lt.s32.totalorder %v1259_v17, 32 }
 0x30d   :  { %v607_v36 = vsel %vm1557_vm5, %v605_v31, %v589_v14  ;;  %v608_v39 = vsel %vm1561_vm10, %v606_v32, %v590_v19  ;;  %vm2014_vm3 = vmmov %vm2013_vm7 }
 0x30e   :  { %v609_v13 = vmax.f32 %v599_v38, %v607_v36  ;;  %v610_v45 = vmax.f32 %v600_v15, %v608_v39 }
 0x30f   :  { %v614_v34 = vpop.permute.xlu1 %613  ;;  %v612_v16 = vpop.permute.xlu0 %611 }
 0x310   :  { %v615_v42 = vsel %vm2013_vm7, %v612_v16, %v614_v34  ;;  %v616_v21 = vsel %vm2014_vm3, %v614_v34, %v612_v16  ;;  %vm2017_vm7 = vnez %v1993_v24  ;;  %vm2018_vm3 = vcmask 64512  }
 0x311   :  { %v617_v43 = vsel %vm1565_vm1, %v616_v21, %v589_v14  ;;  %v618_v44 = vsel %vm1569_vm2, %v615_v42, %v590_v19 }
 0x312   :  { %v620_v50 = vmax.f32 %v610_v45, %v618_v44  ;;  %v619_v53 = vmax.f32 %v609_v13, %v617_v43 }
 0x313   :  { %v624_v46 = vpop.permute.xlu1 %623  ;;  %v622_v47 = vpop.permute.xlu0 %621 }
 0x314   :  { %v625_v48 = vsel %vm2015_vm11, %v622_v47, %v624_v46  ;;  %v626_v49 = vsel %vm2016_vm4, %v624_v46, %v622_v47  ;;  %vm2019_vm11 = vcmp.lt.s32.totalorder %v1259_v17, 1 }
 0x315   :  { %v628_v56 = vsel %vm1597_vm0, %v626_v49, %v590_v19  ;;  %v627_v57 = vsel %vm2017_vm7, %v625_v48, %v589_v14  ;;  %vm2020_vm4 = vmmov %vm2019_vm11 }
 0x316   :  { %v630_v58 = vmax.f32 %v620_v50, %v628_v56  ;;  %v629_v63 = vmax.f32 %v619_v53, %v627_v57 }
 0x318   :  { %666 = vmatprep.subr.mxu1 %v630_v58 }
 0x319   :  { %667 = vmatpush1.msra.mxu1 %v629_v63 }
 0x31a   :  { %1060 = vmatmul.mubr.msk.f32.vlgmr.msra.gmra.mxu1 %vm2018_vm3, %v632_v0  ;;  %vm2021_vm3 = vcmp.lt.s32.totalorder %v1259_v17, 127 }
 0x31b   :  { %1016 = vmatprep.mubr.f32.mxu1 %v1183_v5  ;;  %vm2022_vm0 = vmmov %vm2021_vm3 }
 0x3da   :  { %v1717_v2 = vpop.f32.mrf.mxu1 }
 0x3db   :  { %709 = vrot.lane.b32.xlu0 %v1717_v2, %s1175_s2 }
 0x3dc   :  { %v1721_v3 = vpop.f32.mrf.mxu1 }
 0x3dd   :  { %711 = vrot.lane.b32.xlu1 %v1721_v3, %s1175_s2 }
 0x3df   :  { %719 = vrot.lane.b32.xlu0 %v1717_v2, %s1174_s0 }
 0x3e1   :  { %721 = vrot.lane.b32.xlu1 %v1721_v3, %s1174_s0 }
 0x3e3   :  { %729 = vrot.lane.b32.xlu0 %v1717_v2, %s1176_s28 }
 0x3e5   :  { %731 = vrot.lane.b32.xlu1 %v1721_v3, %s1176_s28 }
 0x3e7   :  { %739 = vrot.lane.b32.xlu0 %v1717_v2, %s1177_s29 }
 0x3e9   :  { %741 = vrot.lane.b32.xlu1 %v1721_v3, %s1177_s29 }
 0x44d   :  { %v710_v5 = vpop.permute.xlu0 %709 }
 0x44f   :  { %v712_v4 = vpop.permute.xlu1 %711 }
 0x450   :  { %v713_v1 = vsel %vm2019_vm11, %v710_v5, %v712_v4  ;;  %v714_v7 = vsel %vm2020_vm4, %v712_v4, %v710_v5  ;;  %vm2025_vm4 = vnez %v1965_v54 }
 0x451   :  { %v720_v6 = vpop.permute.xlu0 %719  ;;  %v715_v14 = vsel %vm1346_vm14, %v714_v7, %v1717_v2  ;;  %v716_v19 = vsel %vm1352_vm6, %v713_v1, %v1721_v3 }
 0x452   :  { %v717_v26 = vmax.f32 %v1717_v2, %v715_v14  ;;  %v718_v28 = vmax.f32 %v1721_v3, %v716_v19 }
 0x453   :  { %v722_v8 = vpop.permute.xlu1 %721 }
 0x454   :  { %v723_v9 = vsel %vm2021_vm3, %v720_v6, %v722_v8  ;;  %v724_v10 = vsel %vm2022_vm0, %v722_v8, %v720_v6  ;;  %vm2023_vm0 = vcmp.lt.s32.totalorder %v1259_v17, 2  ;;  %vm2026_vm3 = vcmp.lt.s32.totalorder %v1259_v17, 126 }
 0x455   :  { %v730_v18 = vpop.permute.xlu0 %729  ;;  %v725_v20 = vsel %vm1338_vm12, %v723_v9, %v1717_v2  ;;  %v726_v11 = vsel %vm1371_vm9, %v724_v10, %v1721_v3  ;;  %vm2024_vm11 = vmmov %vm2023_vm0 }
 0x456   :  { %v727_v36 = vmax.f32 %v717_v26, %v725_v20  ;;  %v728_v39 = vmax.f32 %v718_v28, %v726_v11 }
 0x457   :  { %v732_v25 = vpop.permute.xlu1 %731 }
 0x458   :  { %v733_v31 = vsel %vm2023_vm0, %v730_v18, %v732_v25  ;;  %v734_v32 = vsel %vm2024_vm11, %v732_v25, %v730_v18  ;;  %vm2027_vm0 = vmmov %vm2026_vm3  ;;  %vm2028_vm11 = vnez %v1969_v22 }
 0x459   :  { %v735_v33 = vsel %vm2025_vm4, %v734_v32, %v1717_v2  ;;  %v736_v35 = vsel %vm2004_vm8, %v733_v31, %v1721_v3  ;;  %v740_v34 = vpop.permute.xlu0 %739  ;;  %vm2029_vm4 = vnez %v1971_v29 }
 0x45a   :  { %v737_v38 = vmax.f32 %v727_v36, %v735_v33  ;;  %v738_v15 = vmax.f32 %v728_v39, %v736_v35  ;;  %v790_v39 = vld [vmem:[#allocation7 + $0x10] sm:$0xff] }
 0x45b   :  { %v742_v16 = vpop.permute.xlu1 %741 }
 0x45c   :  { %v743_v42 = vsel %vm2026_vm3, %v740_v34, %v742_v16  ;;  %v744_v21 = vsel %vm2027_vm0, %v742_v16, %v740_v34  ;;  %vm2030_vm3 = vcmp.lt.s32.totalorder %v1259_v17, 16 }
 0x45d   :  { %v745_v43 = vsel %vm2028_vm11, %v743_v42, %v1717_v2  ;;  %v746_v44 = vsel %vm2029_vm4, %v744_v21, %v1721_v3  ;;  %vm2031_vm0 = vmmov %vm2030_vm3  ;;  %vm2032_vm4 = vcmp.lt.s32.totalorder %v1259_v17, 112 }
 0x45e   :  { %v747_v13 = vmax.f32 %v737_v38, %v745_v43  ;;  %v748_v45 = vmax.f32 %v738_v15, %v746_v44  ;;  %vm2033_vm11 = vmmov %vm2032_vm4 }
 0x460   :  { %751 = vrot.lane.b32.xlu1 %v748_v45, %s1178_s30  ;;  %749 = vrot.lane.b32.xlu0 %v747_v13, %s1178_s30 }
 0x464   :  { %761 = vrot.lane.b32.xlu1 %v748_v45, %s1179_s4  ;;  %759 = vrot.lane.b32.xlu0 %v747_v13, %s1179_s4 }
 0x468   :  { %771 = vrot.lane.b32.xlu1 %v748_v45, %s1180_s5  ;;  %769 = vrot.lane.b32.xlu0 %v747_v13, %s1180_s5 }
 0x46c   :  { %781 = vrot.lane.b32.xlu1 %v748_v45, %s1181_s6  ;;  %779 = vrot.lane.b32.xlu0 %v747_v13, %s1181_s6 }
 0x4d2   :  { %v752_v46 = vpop.permute.xlu1 %751  ;;  %v750_v47 = vpop.permute.xlu0 %749 }
 0x4d3   :  { %v753_v48 = vsel %vm2030_vm3, %v750_v47, %v752_v46  ;;  %v754_v49 = vsel %vm2031_vm0, %v752_v46, %v750_v47  ;;  %vm2036_vm3 = vcmp.lt.s32.totalorder %v1259_v17, 96 }
 0x4d4   :  { %v755_v58 = vsel %vm1539_vm13, %v754_v49, %v747_v13  ;;  %v756_v63 = vsel %vm1543_vm15, %v753_v48, %v748_v45  ;;  %vm2037_vm0 = vmmov %vm2036_vm3 }
 0x4d5   :  { %v757_v1 = vmax.f32 %v747_v13, %v755_v58  ;;  %v758_v7 = vmax.f32 %v748_v45, %v756_v63 }
 0x4d6   :  { %v762_v50 = vpop.permute.xlu1 %761  ;;  %v760_v53 = vpop.permute.xlu0 %759 }
 0x4d7   :  { %v763_v56 = vsel %vm2032_vm4, %v760_v53, %v762_v50  ;;  %v764_v57 = vsel %vm2033_vm11, %v762_v50, %v760_v53  ;;  %vm2034_vm4 = vcmp.lt.s32.totalorder %v1259_v17, 32 }
 0x4d8   :  { %v765_v0 = vsel %vm1557_vm5, %v763_v56, %v747_v13  ;;  %v766_v5 = vsel %vm1561_vm10, %v764_v57, %v748_v45  ;;  %vm2035_vm11 = vmmov %vm2034_vm4 }
 0x4d9   :  { %v767_v19 = vmax.f32 %v757_v1, %v765_v0  ;;  %v768_v18 = vmax.f32 %v758_v7, %v766_v5 }
 0x4da   :  { %v772_v4 = vpop.permute.xlu1 %771  ;;  %v770_v6 = vpop.permute.xlu0 %769 }
 0x4db   :  { %v773_v8 = vsel %vm2034_vm4, %v770_v6, %v772_v4  ;;  %v774_v9 = vsel %vm2035_vm11, %v772_v4, %v770_v6  ;;  %vm2038_vm4 = vnez %v1995_v12  ;;  %vm2039_vm11 = vcmask 64512  }
 0x4dc   :  { %v775_v10 = vsel %vm1565_vm1, %v774_v9, %v747_v13  ;;  %v776_v14 = vsel %vm1569_vm2, %v773_v8, %v748_v45 }
 0x4dd   :  { %v777_v25 = vmax.f32 %v767_v19, %v775_v10  ;;  %v778_v26 = vmax.f32 %v768_v18, %v776_v14 }
 0x4de   :  { %v782_v20 = vpop.permute.xlu1 %781  ;;  %v780_v11 = vpop.permute.xlu0 %779 }
 0x4df   :  { %v783_v28 = vsel %vm2036_vm3, %v780_v11, %v782_v20  ;;  %v784_v31 = vsel %vm2037_vm0, %v782_v20, %v780_v11  ;;  %vm2040_vm3 = vcmp.lt.s32.totalorder %v1259_v17, 1 }
 0x4e0   :  { %v785_v32 = vsel %vm2017_vm7, %v783_v28, %v747_v13  ;;  %v786_v33 = vsel %vm2038_vm4, %v784_v31, %v748_v45  ;;  %vm2041_vm0 = vmmov %vm2040_vm3 }
 0x4e1   :  { %v787_v35 = vmax.f32 %v777_v25, %v785_v32  ;;  %v788_v36 = vmax.f32 %v778_v26, %v786_v33 }
 0x4e3   :  { %824 = vmatprep.subr.mxu0 %v788_v36 }
 0x4e4   :  { %825 = vmatpush1.msra.mxu0 %v787_v35 }
 0x4e5   :  { %1061 = vmatmul.mubr.msk.f32.vlgmr.msra.gmra.mxu0 %vm2039_vm11, %v790_v39  ;;  %vm2042_vm11 = vcmp.lt.s32.totalorder %v1259_v17, 127 }
 0x4e6   :  { %vm2043_vm4 = vmmov %vm2042_vm11 }
 0x5a5   :  { %v1820_v34 = vpop.f32.mrf.mxu0 }
 0x5a6   :  { %867 = vrot.lane.b32.xlu0 %v1820_v34, %s1175_s2 }
 0x5a7   :  { %v1824_v16 = vpop.f32.mrf.mxu0 }
 0x5a8   :  { %869 = vrot.lane.b32.xlu1 %v1824_v16, %s1175_s2 }
 0x5aa   :  { %877 = vrot.lane.b32.xlu0 %v1820_v34, %s1174_s0 }
 0x5ac   :  { %879 = vrot.lane.b32.xlu1 %v1824_v16, %s1174_s0 }
 0x5ae   :  { %887 = vrot.lane.b32.xlu0 %v1820_v34, %s1176_s28 }
 0x5b0   :  { %889 = vrot.lane.b32.xlu1 %v1824_v16, %s1176_s28 }
 0x5b2   :  { %897 = vrot.lane.b32.xlu0 %v1820_v34, %s1177_s29 }
 0x5b4   :  { %899 = vrot.lane.b32.xlu1 %v1824_v16, %s1177_s29 }
 0x618   :  { %v868_v38 = vpop.permute.xlu0 %867 }
 0x61a   :  { %v870_v15 = vpop.permute.xlu1 %869 }
 0x61b   :  { %v871_v21 = vsel %vm2040_vm3, %v868_v38, %v870_v15  ;;  %v872_v43 = vsel %vm2041_vm0, %v870_v15, %v868_v38  ;;  %vm2049_vm3 = vnez %v1969_v22  ;;  %vm2050_vm0 = vnez %v1971_v29 }
 0x61c   :  { %v878_v42 = vpop.permute.xlu0 %877  ;;  %v873_v46 = vsel %vm1346_vm14, %v872_v43, %v1820_v34  ;;  %v874_v47 = vsel %vm1352_vm6, %v871_v21, %v1824_v16  ;;  %vm2044_vm14 = vcmp.lt.s32.totalorder %v1259_v17, 2  ;;  %vm2046_vm6 = vnez %v1965_v54 }
 0x61d   :  { %v875_v56 = vmax.f32 %v1820_v34, %v873_v46  ;;  %v876_v57 = vmax.f32 %v1824_v16, %v874_v47  ;;  %v948_v47 = vld [vmem:[#allocation7 + $0x18] sm:$0xff] }
 0x61e   :  { %v880_v44 = vpop.permute.xlu1 %879 }
 0x61f   :  { %v881_v13 = vsel %vm2042_vm11, %v878_v42, %v880_v44  ;;  %v882_v45 = vsel %vm2043_vm4, %v880_v44, %v878_v42  ;;  %vm2045_vm4 = vmmov %vm2044_vm14 }
 0x620   :  { %v888_v48 = vpop.permute.xlu0 %887  ;;  %v883_v49 = vsel %vm1338_vm12, %v881_v13, %v1820_v34  ;;  %v884_v50 = vsel %vm1371_vm9, %v882_v45, %v1824_v16  ;;  %vm2047_vm12 = vcmp.lt.s32.totalorder %v1259_v17, 126 }
 0x621   :  { %v885_v58 = vmax.f32 %v875_v56, %v883_v49  ;;  %v886_v63 = vmax.f32 %v876_v57, %v884_v50  ;;  %vm2048_vm9 = vmmov %vm2047_vm12 }
 0x622   :  { %v890_v53 = vpop.permute.xlu1 %889 }
 0x623   :  { %v891_v27 = vsel %vm2044_vm14, %v888_v48, %v890_v53  ;;  %v892_v30 = vsel %vm2045_vm4, %v890_v53, %v888_v48  ;;  %vm2053_vm14 = vcmp.lt.s32.totalorder %v1259_v17, 112  ;;  %v1080_v48 = vld [vmem:[#allocation5] sm:$0xff] }
 0x624   :  { %v893_v23 = vsel %vm2046_vm6, %v892_v30, %v1820_v34  ;;  %v894_v40 = vsel %vm2004_vm8, %v891_v27, %v1824_v16  ;;  %v898_v0 = vpop.permute.xlu0 %897  ;;  %vm2051_vm8 = vcmp.lt.s32.totalorder %v1259_v17, 16  ;;  %vm2054_vm4 = vmmov %vm2053_vm14  ;;  %vm2055_vm6 = vcmp.lt.s32.totalorder %v1259_v17, 32 }
 0x625   :  { %v895_v4 = vmax.f32 %v885_v58, %v893_v23  ;;  %v896_v6 = vmax.f32 %v886_v63, %v894_v40  ;;  %vm2052_vm11 = vmmov %vm2051_vm8  ;;  %v549_v49 = vadd.f32 %v1080_v48, %v1613_v41 }
 0x626   :  { %v900_v5 = vpop.permute.xlu1 %899 }
 0x627   :  { %v901_v1 = vsel %vm2047_vm12, %v898_v0, %v900_v5  ;;  %v902_v7 = vsel %vm2048_vm9, %v900_v5, %v898_v0  ;;  %vm2056_vm12 = vmmov %vm2055_vm6  ;;  %v707_v50 = vadd.f32 %v1717_v2, %v549_v49 }
 0x628   :  { %v903_v54 = vsel %vm2049_vm3, %v901_v1, %v1820_v34  ;;  %v904_v55 = vsel %vm2050_vm0, %v902_v7, %v1824_v16 }
 0x629   :  { %v905_v8 = vmax.f32 %v895_v4, %v903_v54  ;;  %v906_v9 = vmax.f32 %v896_v6, %v904_v55  ;;  %v865_v24 = vadd.f32 %v1820_v34, %v707_v50 }
 0x62b   :  { %909 = vrot.lane.b32.xlu1 %v906_v9, %s1178_s30  ;;  %907 = vrot.lane.b32.xlu0 %v905_v8, %s1178_s30 }
 0x62f   :  { %919 = vrot.lane.b32.xlu1 %v906_v9, %s1179_s4  ;;  %917 = vrot.lane.b32.xlu0 %v905_v8, %s1179_s4 }
 0x633   :  { %929 = vrot.lane.b32.xlu1 %v906_v9, %s1180_s5  ;;  %927 = vrot.lane.b32.xlu0 %v905_v8, %s1180_s5 }
 0x637   :  { %939 = vrot.lane.b32.xlu1 %v906_v9, %s1181_s6  ;;  %937 = vrot.lane.b32.xlu0 %v905_v8, %s1181_s6 }
 0x69d   :  { %v910_v22 = vpop.permute.xlu1 %909  ;;  %v908_v29 = vpop.permute.xlu0 %907 }
 0x69e   :  { %v911_v10 = vsel %vm2051_vm8, %v908_v29, %v910_v22  ;;  %v912_v14 = vsel %vm2052_vm11, %v910_v22, %v908_v29 }
 0x69f   :  { %v913_v25 = vsel %vm1539_vm13, %v912_v14, %v905_v8  ;;  %v914_v26 = vsel %vm1543_vm15, %v911_v10, %v906_v9  ;;  %vm2057_vm13 = vcmp.lt.s32.totalorder %v1259_v17, 96  ;;  %v1081_v17 = vld [vmem:[#allocation5 + $0x8] sm:$0xff] }
 0x6a0   :  { %v915_v35 = vmax.f32 %v905_v8, %v913_v25  ;;  %v916_v36 = vmax.f32 %v906_v9, %v914_v26  ;;  %vm2058_vm15 = vmmov %vm2057_vm13  ;;  %v550_v53 = vadd.f32 %v1081_v17, %v1617_v37 }
 0x6a1   :  { %v920_v19 = vpop.permute.xlu1 %919  ;;  %v918_v18 = vpop.permute.xlu0 %917 }
 0x6a2   :  { %v921_v20 = vsel %vm2053_vm14, %v918_v18, %v920_v19  ;;  %v922_v11 = vsel %vm2054_vm4, %v920_v19, %v918_v18 }
 0x6a3   :  { %v923_v28 = vsel %vm1557_vm5, %v921_v20, %v905_v8  ;;  %v924_v31 = vsel %vm1561_vm10, %v922_v11, %v906_v9  ;;  %vm2059_vm5 = vnez %v1995_v12  ;;  %vm2060_vm10 = vcmask 64512  }
 0x6a4   :  { %v925_v38 = vmax.f32 %v915_v35, %v923_v28  ;;  %v926_v15 = vmax.f32 %v916_v36, %v924_v31  ;;  %v708_v12 = vadd.f32 %v1721_v3, %v550_v53 }
 0x6a5   :  { %v930_v32 = vpop.permute.xlu1 %929  ;;  %v928_v33 = vpop.permute.xlu0 %927 }
 0x6a6   :  { %v931_v39 = vsel %vm2055_vm6, %v928_v33, %v930_v32  ;;  %v932_v51 = vsel %vm2056_vm12, %v930_v32, %v928_v33  ;;  %v866_v27 = vadd.f32 %v1824_v16, %v708_v12 }
 0x6a7   :  { %v933_v52 = vsel %vm1565_vm1, %v932_v51, %v905_v8  ;;  %v934_v59 = vsel %vm1569_vm2, %v931_v39, %v906_v9 }
 0x6a8   :  { %v935_v21 = vmax.f32 %v925_v38, %v933_v52  ;;  %v936_v43 = vmax.f32 %v926_v15, %v934_v59 }
 0x6a9   :  { %v940_v60 = vpop.permute.xlu1 %939  ;;  %v938_v42 = vpop.permute.xlu0 %937 }
 0x6aa   :  { %v941_v44 = vsel %vm2057_vm13, %v938_v42, %v940_v60  ;;  %v942_v13 = vsel %vm2058_vm15, %v940_v60, %v938_v42 }
 0x6ab   :  { %v943_v45 = vsel %vm2017_vm7, %v941_v44, %v905_v8  ;;  %v944_v61 = vsel %vm2059_vm5, %v942_v13, %v906_v9 }
 0x6ac   :  { %v945_v62 = vmax.f32 %v935_v21, %v943_v45  ;;  %v946_v46 = vmax.f32 %v936_v43, %v944_v61 }
 0x6ae   :  { %982 = vmatprep.subr.mxu1 %v946_v46 }
 0x6af   :  { %983 = vmatpush1.msra.mxu1 %v945_v62 }
 0x6b0   :  { %1062 = vmatmul.mubr.msk.f32.vlgmr.msra.gmra.mxu1 %vm2060_vm10, %v948_v47 }
 0x770   :  { %v1018_v56 = vpop.f32.mrf.mxu1 }
 0x771   :  { %v1023_v57 = vadd.f32 %v1018_v56, %v865_v24 }
 0x772   :  { %v1020_v30 = vpop.f32.mrf.mxu1 }
 0x773   :  { %1025 = vst [vmem:[#allocation8] sm:$0xff] %v1023_v57  ;;  %v1024_v23 = vadd.f32 %v1020_v30, %v866_v27 }
 0x775   :  { %1026 = vst [vmem:[#allocation8 + $0x8] sm:$0xff] %v1024_v23 }
 0x776   :  { %1153 = shalt.err (!%p1150_p5)
}
 0x777   :  { %1036 = dma.vmem_to_hbm [thread:$0]  %s1034_s8, 256, %s1935_s3, [#allocation4]  }
 0x778   :  { %1166 = dma.done.wait [#allocation4], 256  }
 0x779   :  { %1167 = vsyncadd [#allocation4], 4294967040 }
 0x77a   :  { %1040 = vsyncpa [#allocation3], 1 }
 0x77b   :  { %1041 = vsyncpa [#allocation6], 1 }
 0x77c   :  { %1042 = vsyncpa [#allocation4], 1 }

</bundles_post_ra>
